<compile_context>
chip_gen: v7x
topology: tpu7x:2x2x1
jax: 0.10.0
libtpu: 0.0.40
codegen_flags: <defaults>
</compile_context>

<pallas_src>
import functools

import jax
import jax.numpy as jnp
import numpy as np
from jax.experimental import pallas as pl
from jax.experimental.pallas import tpu as pltpu

SCALE = 1.7519
GAMMA = 0.05
TB = 8          # images per grid step; keeps every in-kernel row slice 8-aligned

# channel subsets of the 16 partially-connected C3 convolutions
C3_SUBSETS = [
    [0, 1, 2], [1, 2, 3], [2, 3, 4], [3, 4, 5], [0, 4, 5], [0, 1, 5],
    [0, 1, 2, 3], [1, 2, 3, 4], [2, 3, 4, 5], [0, 3, 4, 5], [0, 1, 4, 5],
    [0, 1, 2, 5], [0, 1, 3, 4], [1, 2, 4, 5], [0, 2, 3, 5],
    [0, 1, 2, 3, 4, 5],
]


# ------------------------------ Pallas kernel --------------------------------

def _lenet_kernel(x_ref, t1_ref, b1_ref, q2_ref, p2_ref, t3_ref, b3_ref,
                  q4_ref, p4_ref, t5_ref, b5_ref, w6_ref, b6_ref, ct_ref,
                  csq_ref, o_ref, *, tb):
    f32 = jnp.float32
    bf16 = jnp.bfloat16

    def bdot(a, b):
        # bf16 MXU matmul, f32 accumulation.
        return jnp.dot(a.astype(bf16), b.astype(bf16),
                       preferred_element_type=f32)

    def conv_relu(a, t_ref, b_ref, h_out):
        # 5x5 "valid" conv of the (H*tb, W*Cin) slab: 5 shifted matmuls against
        # per-dy Toeplitz matrices of shape (W_in*Cin, W_out*Cout).
        acc = bdot(a[0:h_out * tb, :], t_ref[0]) + b_ref[...]
        for dy in range(1, 5):
            acc = acc + bdot(a[dy * tb:dy * tb + h_out * tb, :], t_ref[dy])
        return jnp.maximum(acc, 0.0)

    def pool(a, q_ref, p_ref):
        # AvgPool2d(2,2): rows pooled from the left (Q), width/channel lanes
        # pooled from the right (P); both on the MXU, output lane-dense.
        return bdot(bdot(q_ref[...], a), p_ref[...])

    x = x_ref[0]                                      # (32*tb, 32)   f32
    y = conv_relu(x, t1_ref, b1_ref, 28)              # (28*tb, 168)
    y = pool(y, q2_ref, p2_ref)                       # (14*tb,  84)
    y = conv_relu(y, t3_ref, b3_ref, 10)              # (10*tb, 160)
    y = pool(y, q4_ref, p4_ref)                       # ( 5*tb,  80)
    y = conv_relu(y, t5_ref, b5_ref, 1)               # (tb, 120)
    y = jnp.tanh(bdot(y, w6_ref[...]) + b6_ref[...]) * SCALE     # (tb, 84)

    # RBF head: ||y||^2 - 2*y@c^T + ||c||^2, cross term on the MXU.
    cross = bdot(y, ct_ref[...])                      # (tb, 10)
    ysq = jnp.sum(y * y, axis=1, keepdims=True)       # (tb, 1)
    dist = (ysq - 2.0 * cross) + csq_ref[...]         # (tb, 10)
    o_ref[0] = jnp.exp(-GAMMA * dist)


# ---------------------- host-side weight preparation -------------------------

def _toeplitz(w, w_in):
    """w: (Cout, Cin, 5, 5) -> (5, w_in*Cin, w_out*Cout) per-dy row-Toeplitz."""
    c_out, c_in, k, _ = w.shape
    w_out = w_in - k + 1
    t = np.zeros((k, w_in * c_in, w_out * c_out), np.float32)
    for dy in range(k):
        for dx in range(k):
            blk = w[:, :, dy, dx].T                       # (Cin, Cout)
            for j in range(w_out):
                t[dy, (j + dx) * c_in:(j + dx + 1) * c_in,
                  j * c_out:(j + 1) * c_out] = blk
    return t


def _pool_mats(h, w, c, tb):
    """Left (Q) / right (P) matrices implementing AvgPool2d(2,2) on the slab."""
    ho, wo = h // 2, w // 2
    q = np.zeros((ho * tb, h * tb), np.float32)
    for io in range(ho):
        for b in range(tb):
            q[io * tb + b, (2 * io) * tb + b] = 0.5
            q[io * tb + b, (2 * io + 1) * tb + b] = 0.5
    p = np.zeros((w * c, wo * c), np.float32)
    for jo in range(wo):
        for ch in range(c):
            p[(2 * jo) * c + ch, jo * c + ch] = 0.5
            p[(2 * jo + 1) * c + ch, jo * c + ch] = 0.5
    return q, p


def init_params(key):
    """PyTorch-layout parameters of LeNet5RBF."""
    ks = jax.random.split(key, 40)

    def nrm(k, shape, scale=0.1):
        return scale * jax.random.normal(k, shape, jnp.float32)

    return dict(
        w1=nrm(ks[0], (6, 1, 5, 5)), b1=nrm(ks[1], (6,)),
        w3=[nrm(ks[8 + i], (1, len(c), 5, 5)) for i, c in enumerate(C3_SUBSETS)],
        b3=[nrm(ks[24 + i], (1,)) for i in range(16)],
        w5=nrm(ks[2], (120, 16, 5, 5)), b5=nrm(ks[3], (120,)),
        w6=nrm(ks[4], (84, 120)), b6=nrm(ks[5], (84,)),
        centers=jax.random.normal(ks[6], (10, 84), jnp.float32),
    )


def pack_params(params, tb=TB):
    """Build the fused-kernel weight set (Toeplitz convs, pool matmuls, bf16)."""
    f32 = np.float32

    # zero-padded dense C3 weight (16, 6, 5, 5) encoding the partial connections
    w3f = np.zeros((16, 6, 5, 5), f32)
    b3f = np.zeros((16,), f32)
    for i, chans in enumerate(C3_SUBSETS):
        wi = np.asarray(params["w3"][i], f32)
        for j, c in enumerate(chans):
            w3f[i, c] = wi[0, j]
        b3f[i] = np.asarray(params["b3"][i], f32)[0]

    t1 = _toeplitz(np.asarray(params["w1"], f32), 32)      # (5, 32, 168)
    t3 = _toeplitz(w3f, 14)                                 # (5, 84, 160)
    t5 = _toeplitz(np.asarray(params["w5"], f32), 5)        # (5, 80, 120)
    q2, p2 = _pool_mats(28, 28, 6, tb)
    q4, p4 = _pool_mats(10, 10, 16, tb)

    ct = jnp.asarray(np.asarray(params["centers"], f32).T, jnp.bfloat16)  # (84,10)
    csq = jnp.sum(ct.astype(jnp.float32) ** 2, axis=0, keepdims=True)     # (1,10)

    def b16(a):
        return jnp.asarray(a, jnp.bfloat16)

    def f(a):
        return jnp.asarray(a, jnp.float32)

    return dict(
        t1=b16(t1), b1=f(np.tile(np.asarray(params["b1"], f32), 28)[None, :]),
        q2=b16(q2), p2=b16(p2),
        t3=b16(t3), b3=f(np.tile(b3f, 10)[None, :]),
        q4=b16(q4), p4=b16(p4),
        t5=b16(t5), b5=f(np.asarray(params["b5"], f32)[None, :]),
        w6=b16(np.asarray(params["w6"], f32).T),
        b6=f(np.asarray(params["b6"], f32)[None, :]),
        ct=ct, csq=csq,
    )


# --------------------------------- wrapper ------------------------------------

_KERNEL_ARGS = ("t1", "b1", "q2", "p2", "t3", "b3", "q4", "p4",
                "t5", "b5", "w6", "b6", "ct", "csq")


def _full_spec(a):
    nd = a.ndim
    return pl.BlockSpec(a.shape, lambda t, _nd=nd: (0,) * _nd)


def forward(x, packed, tb=TB):
    """x: (B, 1, 32, 32) NCHW -> (B, 10)."""
    b = x.shape[0]
    h, w = x.shape[2], x.shape[3]
    pad = (-b) % tb
    if pad:
        x = jnp.concatenate([x, jnp.zeros((pad,) + x.shape[1:], x.dtype)], 0)
    bp = b + pad
    nt = bp // tb

    # slab layout: tile t holds row r = i*tb + bb for image t*tb + bb
    xr = (x.reshape(bp, h, w)
           .reshape(nt, tb, h, w)
           .transpose(0, 2, 1, 3)
           .reshape(nt, h * tb, w))

    weights = [packed[k] for k in _KERNEL_ARGS]
    in_specs = [pl.BlockSpec((1, h * tb, w), lambda t: (t, 0, 0))]
    in_specs += [_full_spec(a) for a in weights]

    out = pl.pallas_call(
        functools.partial(_lenet_kernel, tb=tb),
        out_shape=jax.ShapeDtypeStruct((nt, tb, 10), jnp.float32),
        grid=(nt,),
        in_specs=in_specs,
        out_specs=pl.BlockSpec((1, tb, 10), lambda t: (t, 0, 0)),
        compiler_params=pltpu.CompilerParams(
            dimension_semantics=("parallel",),          # 2 TCs on v7x
            vmem_limit_bytes=32 * 1024 * 1024),         # safe on v5e/v6e/v7x
    )(xr, *weights)
    return out.reshape(bp, 10)[:b]


# -------------------------------- reference -----------------------------------

def reference_forward(x, params, gamma=GAMMA):
    """Pure-JAX reference with the PyTorch module's semantics, mirroring the
    kernel's bf16-matmul / f32-accumulate numerics for a tight comparison."""
    f32 = jnp.float32
    bf16 = jnp.bfloat16

    def bdot(a, b):
        return jnp.dot(a.astype(bf16), b.astype(bf16), preferred_element_type=f32)

    def conv(a, w, bias):                    # a: (B,H,W,Cin), w: (Cout,Cin,5,5)
        n, hh, ww, cin = a.shape
        cout, _, k, _ = w.shape
        ho, wo = hh - k + 1, ww - k + 1
        cols = [a[:, dy:dy + ho, dx:dx + wo, :]
                for dy in range(k) for dx in range(k)]
        p = jnp.stack(cols, axis=3).reshape(n * ho * wo, k * k * cin)
        wm = jnp.transpose(w, (2, 3, 1, 0)).reshape(k * k * cin, cout)
        return (bdot(p, wm) + bias).reshape(n, ho, wo, cout)

    def pool(a):                             # AvgPool2d(2, 2)
        a = a.astype(bf16).astype(f32)       # mirror the kernel's bf16 input cast
        n, hh, ww, c = a.shape
        return a.reshape(n, hh // 2, 2, ww // 2, 2, c).mean(axis=(2, 4))

    n = x.shape[0]
    a = x.reshape(n, 32, 32, 1)              # NCHW (C=1) -> NHWC
    a = pool(jnp.maximum(conv(a, params["w1"], params["b1"]), 0.0))
    outs = [conv(a[..., chans], params["w3"][i], params["b3"][i])
            for i, chans in enumerate(C3_SUBSETS)]
    a = pool(jnp.maximum(jnp.concatenate(outs, axis=-1), 0.0))
    a = jnp.maximum(conv(a, params["w5"], params["b5"]), 0.0).reshape(n, 120)
    y = jnp.tanh(bdot(a, params["w6"].T) + params["b6"]) * SCALE

    c = params["centers"]
    cb = c.astype(bf16).astype(f32)
    cross = bdot(y, c.T)                                           # (B, 10)
    dist = (jnp.sum(y * y, axis=1, keepdims=True) - 2.0 * cross
            + jnp.sum(cb * cb, axis=1)[None, :])
    return jnp.exp(-gamma * dist)


# ----------------------------------- main --------------------------------------

if __name__ == "__main__":
    key = jax.random.PRNGKey(0)
    kx, kp = jax.random.split(key)
    params = init_params(kp)
    packed = pack_params(params, TB)

    # classic LeNet-5 geometry requires 32x32 single-channel input
    B = 16
    x = jax.random.normal(kx, (B, 1, 32, 32), jnp.float32)

    out = jax.block_until_ready(jax.jit(forward)(x, packed))
    ref = jax.block_until_ready(jax.jit(reference_forward)(x, params))

    assert out.shape == (B, 10), out.shape
    np.testing.assert_allclose(np.asarray(out), np.asarray(ref, np.float32),
                               rtol=5e-2, atol=1e-3)
    print("KERNEL_OK")
</pallas_src>

<mosaic_0001>
module attributes {stable_mosaic.version = 11 : i64} {
  func.func @_lenet_kernel(%arg0: i32, %arg1: memref<1x256x32xf32, #tpu.memory_space<vmem>>, %arg2: memref<5x32x168xbf16, #tpu.memory_space<vmem>>, %arg3: memref<1x168xf32, #tpu.memory_space<vmem>>, %arg4: memref<112x224xbf16, #tpu.memory_space<vmem>>, %arg5: memref<168x84xbf16, #tpu.memory_space<vmem>>, %arg6: memref<5x84x160xbf16, #tpu.memory_space<vmem>>, %arg7: memref<1x160xf32, #tpu.memory_space<vmem>>, %arg8: memref<40x80xbf16, #tpu.memory_space<vmem>>, %arg9: memref<160x80xbf16, #tpu.memory_space<vmem>>, %arg10: memref<5x80x120xbf16, #tpu.memory_space<vmem>>, %arg11: memref<1x120xf32, #tpu.memory_space<vmem>>, %arg12: memref<120x84xbf16, #tpu.memory_space<vmem>>, %arg13: memref<1x84xf32, #tpu.memory_space<vmem>>, %arg14: memref<84x10xbf16, #tpu.memory_space<vmem>>, %arg15: memref<1x10xf32, #tpu.memory_space<vmem>>, %arg16: memref<1x8x10xf32, #tpu.memory_space<vmem>>) attributes {dimension_semantics = [#tpu.dimension_semantics<parallel>], iteration_bounds = array<i64: 2>, scalar_prefetch = 0 : i64, scratch_operands = 0 : i64, tpu.core_type = #tpu.core_type<tc>, window_params = [{transform_indices = @transform_0, window_bounds = array<i64: 1, 256, 32>}, {pipeline_mode = #tpu.pipeline_mode<synchronous>, transform_indices = @transform_1, window_bounds = array<i64: 5, 32, 168>}, {pipeline_mode = #tpu.pipeline_mode<synchronous>, transform_indices = @transform_2, window_bounds = array<i64: 1, 168>}, {pipeline_mode = #tpu.pipeline_mode<synchronous>, transform_indices = @transform_3, window_bounds = array<i64: 112, 224>}, {pipeline_mode = #tpu.pipeline_mode<synchronous>, transform_indices = @transform_4, window_bounds = array<i64: 168, 84>}, {pipeline_mode = #tpu.pipeline_mode<synchronous>, transform_indices = @transform_5, window_bounds = array<i64: 5, 84, 160>}, {pipeline_mode = #tpu.pipeline_mode<synchronous>, transform_indices = @transform_6, window_bounds = array<i64: 1, 160>}, {pipeline_mode = #tpu.pipeline_mode<synchronous>, transform_indices = @transform_7, window_bounds = array<i64: 40, 80>}, {pipeline_mode = #tpu.pipeline_mode<synchronous>, transform_indices = @transform_8, window_bounds = array<i64: 160, 80>}, {pipeline_mode = #tpu.pipeline_mode<synchronous>, transform_indices = @transform_9, window_bounds = array<i64: 5, 80, 120>}, {pipeline_mode = #tpu.pipeline_mode<synchronous>, transform_indices = @transform_10, window_bounds = array<i64: 1, 120>}, {pipeline_mode = #tpu.pipeline_mode<synchronous>, transform_indices = @transform_11, window_bounds = array<i64: 120, 84>}, {pipeline_mode = #tpu.pipeline_mode<synchronous>, transform_indices = @transform_12, window_bounds = array<i64: 1, 84>}, {pipeline_mode = #tpu.pipeline_mode<synchronous>, transform_indices = @transform_13, window_bounds = array<i64: 84, 10>}, {pipeline_mode = #tpu.pipeline_mode<synchronous>, transform_indices = @transform_14, window_bounds = array<i64: 1, 10>}, {transform_indices = @transform_15, window_bounds = array<i64: 1, 8, 10>}]} {
    %c0 = arith.constant 0 : index
    %c0_0 = arith.constant 0 : index
    %c0_1 = arith.constant 0 : index
    %0 = vector.load %arg1[%c0, %c0_0, %c0_1] : memref<1x256x32xf32, #tpu.memory_space<vmem>>, vector<1x256x32xf32>
    %1 = vector.shape_cast %0 : vector<1x256x32xf32> to vector<256x32xf32>
    %2 = vector.extract_strided_slice %1 {offsets = [0, 0], sizes = [224, 32], strides = [1, 1]} : vector<256x32xf32> to vector<224x32xf32>
    %c0_2 = arith.constant 0 : index
    %c0_3 = arith.constant 0 : index
    %c0_4 = arith.constant 0 : index
    %3 = vector.load %arg2[%c0_2, %c0_3, %c0_4] : memref<5x32x168xbf16, #tpu.memory_space<vmem>>, vector<1x32x168xbf16>
    %4 = vector.shape_cast %3 : vector<1x32x168xbf16> to vector<32x168xbf16>
    %5 = arith.truncf %2 : vector<224x32xf32> to vector<224x32xbf16>
    %cst = arith.constant dense<0.000000e+00> : vector<224x168xf32>
    %6 = tpu.matmul %5, %4, %cst {dimension_numbers = #tpu.dot_dimension_numbers<[1], [0], [0], [1], [0, 0, 1, 1], [], []>} : vector<224x32xbf16>, vector<32x168xbf16>, vector<224x168xf32> -> vector<224x168xf32>
    %c0_5 = arith.constant 0 : index
    %c0_6 = arith.constant 0 : index
    %7 = vector.load %arg3[%c0_5, %c0_6] : memref<1x168xf32, #tpu.memory_space<vmem>>, vector<1x168xf32>
    %8 = vector.broadcast %7 : vector<1x168xf32> to vector<224x168xf32>
    %9 = arith.addf %6, %8 : vector<224x168xf32>
    %10 = vector.extract_strided_slice %1 {offsets = [8, 0], sizes = [224, 32], strides = [1, 1]} : vector<256x32xf32> to vector<224x32xf32>
    %c1 = arith.constant 1 : index
    %c0_7 = arith.constant 0 : index
    %c0_8 = arith.constant 0 : index
    %11 = vector.load %arg2[%c1, %c0_7, %c0_8] : memref<5x32x168xbf16, #tpu.memory_space<vmem>>, vector<1x32x168xbf16>
    %12 = vector.shape_cast %11 : vector<1x32x168xbf16> to vector<32x168xbf16>
    %13 = arith.truncf %10 : vector<224x32xf32> to vector<224x32xbf16>
    %cst_9 = arith.constant dense<0.000000e+00> : vector<224x168xf32>
    %14 = tpu.matmul %13, %12, %cst_9 {dimension_numbers = #tpu.dot_dimension_numbers<[1], [0], [0], [1], [0, 0, 1, 1], [], []>} : vector<224x32xbf16>, vector<32x168xbf16>, vector<224x168xf32> -> vector<224x168xf32>
    %15 = arith.addf %9, %14 : vector<224x168xf32>
    %16 = vector.extract_strided_slice %1 {offsets = [16, 0], sizes = [224, 32], strides = [1, 1]} : vector<256x32xf32> to vector<224x32xf32>
    %c2 = arith.constant 2 : index
    %c0_10 = arith.constant 0 : index
    %c0_11 = arith.constant 0 : index
    %17 = vector.load %arg2[%c2, %c0_10, %c0_11] : memref<5x32x168xbf16, #tpu.memory_space<vmem>>, vector<1x32x168xbf16>
    %18 = vector.shape_cast %17 : vector<1x32x168xbf16> to vector<32x168xbf16>
    %19 = arith.truncf %16 : vector<224x32xf32> to vector<224x32xbf16>
    %cst_12 = arith.constant dense<0.000000e+00> : vector<224x168xf32>
    %20 = tpu.matmul %19, %18, %cst_12 {dimension_numbers = #tpu.dot_dimension_numbers<[1], [0], [0], [1], [0, 0, 1, 1], [], []>} : vector<224x32xbf16>, vector<32x168xbf16>, vector<224x168xf32> -> vector<224x168xf32>
    %21 = arith.addf %15, %20 : vector<224x168xf32>
    %22 = vector.extract_strided_slice %1 {offsets = [24, 0], sizes = [224, 32], strides = [1, 1]} : vector<256x32xf32> to vector<224x32xf32>
    %c3 = arith.constant 3 : index
    %c0_13 = arith.constant 0 : index
    %c0_14 = arith.constant 0 : index
    %23 = vector.load %arg2[%c3, %c0_13, %c0_14] : memref<5x32x168xbf16, #tpu.memory_space<vmem>>, vector<1x32x168xbf16>
    %24 = vector.shape_cast %23 : vector<1x32x168xbf16> to vector<32x168xbf16>
    %25 = arith.truncf %22 : vector<224x32xf32> to vector<224x32xbf16>
    %cst_15 = arith.constant dense<0.000000e+00> : vector<224x168xf32>
    %26 = tpu.matmul %25, %24, %cst_15 {dimension_numbers = #tpu.dot_dimension_numbers<[1], [0], [0], [1], [0, 0, 1, 1], [], []>} : vector<224x32xbf16>, vector<32x168xbf16>, vector<224x168xf32> -> vector<224x168xf32>
    %27 = arith.addf %21, %26 : vector<224x168xf32>
    %28 = vector.extract_strided_slice %1 {offsets = [32, 0], sizes = [224, 32], strides = [1, 1]} : vector<256x32xf32> to vector<224x32xf32>
    %c4 = arith.constant 4 : index
    %c0_16 = arith.constant 0 : index
    %c0_17 = arith.constant 0 : index
    %29 = vector.load %arg2[%c4, %c0_16, %c0_17] : memref<5x32x168xbf16, #tpu.memory_space<vmem>>, vector<1x32x168xbf16>
    %30 = vector.shape_cast %29 : vector<1x32x168xbf16> to vector<32x168xbf16>
    %31 = arith.truncf %28 : vector<224x32xf32> to vector<224x32xbf16>
    %cst_18 = arith.constant dense<0.000000e+00> : vector<224x168xf32>
    %32 = tpu.matmul %31, %30, %cst_18 {dimension_numbers = #tpu.dot_dimension_numbers<[1], [0], [0], [1], [0, 0, 1, 1], [], []>} : vector<224x32xbf16>, vector<32x168xbf16>, vector<224x168xf32> -> vector<224x168xf32>
    %33 = arith.addf %27, %32 : vector<224x168xf32>
    %cst_19 = arith.constant 0.000000e+00 : f32
    %34 = vector.broadcast %cst_19 : f32 to vector<224x168xf32>
    %35 = arith.maximumf %33, %34 : vector<224x168xf32>
    %c0_20 = arith.constant 0 : index
    %c0_21 = arith.constant 0 : index
    %36 = vector.load %arg4[%c0_20, %c0_21] : memref<112x224xbf16, #tpu.memory_space<vmem>>, vector<112x224xbf16>
    %37 = arith.truncf %35 : vector<224x168xf32> to vector<224x168xbf16>
    %cst_22 = arith.constant dense<0.000000e+00> : vector<112x168xf32>
    %38 = tpu.matmul %36, %37, %cst_22 {dimension_numbers = #tpu.dot_dimension_numbers<[1], [0], [0], [1], [0, 0, 1, 1], [], []>} : vector<112x224xbf16>, vector<224x168xbf16>, vector<112x168xf32> -> vector<112x168xf32>
    %c0_23 = arith.constant 0 : index
    %c0_24 = arith.constant 0 : index
    %39 = vector.load %arg5[%c0_23, %c0_24] : memref<168x84xbf16, #tpu.memory_space<vmem>>, vector<168x84xbf16>
    %40 = arith.truncf %38 : vector<112x168xf32> to vector<112x168xbf16>
    %cst_25 = arith.constant dense<0.000000e+00> : vector<112x84xf32>
    %41 = tpu.matmul %40, %39, %cst_25 {dimension_numbers = #tpu.dot_dimension_numbers<[1], [0], [0], [1], [0, 0, 1, 1], [], []>} : vector<112x168xbf16>, vector<168x84xbf16>, vector<112x84xf32> -> vector<112x84xf32>
    %42 = vector.extract_strided_slice %41 {offsets = [0, 0], sizes = [80, 84], strides = [1, 1]} : vector<112x84xf32> to vector<80x84xf32>
    %c0_26 = arith.constant 0 : index
    %c0_27 = arith.constant 0 : index
    %c0_28 = arith.constant 0 : index
    %43 = vector.load %arg6[%c0_26, %c0_27, %c0_28] : memref<5x84x160xbf16, #tpu.memory_space<vmem>>, vector<1x84x160xbf16>
    %44 = vector.shape_cast %43 : vector<1x84x160xbf16> to vector<84x160xbf16>
    %45 = arith.truncf %42 : vector<80x84xf32> to vector<80x84xbf16>
    %cst_29 = arith.constant dense<0.000000e+00> : vector<80x160xf32>
    %46 = tpu.matmul %45, %44, %cst_29 {dimension_numbers = #tpu.dot_dimension_numbers<[1], [0], [0], [1], [0, 0, 1, 1], [], []>} : vector<80x84xbf16>, vector<84x160xbf16>, vector<80x160xf32> -> vector<80x160xf32>
    %c0_30 = arith.constant 0 : index
    %c0_31 = arith.constant 0 : index
    %47 = vector.load %arg7[%c0_30, %c0_31] : memref<1x160xf32, #tpu.memory_space<vmem>>, vector<1x160xf32>
    %48 = vector.broadcast %47 : vector<1x160xf32> to vector<80x160xf32>
    %49 = arith.addf %46, %48 : vector<80x160xf32>
    %50 = vector.extract_strided_slice %41 {offsets = [8, 0], sizes = [80, 84], strides = [1, 1]} : vector<112x84xf32> to vector<80x84xf32>
    %c1_32 = arith.constant 1 : index
    %c0_33 = arith.constant 0 : index
    %c0_34 = arith.constant 0 : index
    %51 = vector.load %arg6[%c1_32, %c0_33, %c0_34] : memref<5x84x160xbf16, #tpu.memory_space<vmem>>, vector<1x84x160xbf16>
    %52 = vector.shape_cast %51 : vector<1x84x160xbf16> to vector<84x160xbf16>
    %53 = arith.truncf %50 : vector<80x84xf32> to vector<80x84xbf16>
    %cst_35 = arith.constant dense<0.000000e+00> : vector<80x160xf32>
    %54 = tpu.matmul %53, %52, %cst_35 {dimension_numbers = #tpu.dot_dimension_numbers<[1], [0], [0], [1], [0, 0, 1, 1], [], []>} : vector<80x84xbf16>, vector<84x160xbf16>, vector<80x160xf32> -> vector<80x160xf32>
    %55 = arith.addf %49, %54 : vector<80x160xf32>
    %56 = vector.extract_strided_slice %41 {offsets = [16, 0], sizes = [80, 84], strides = [1, 1]} : vector<112x84xf32> to vector<80x84xf32>
    %c2_36 = arith.constant 2 : index
    %c0_37 = arith.constant 0 : index
    %c0_38 = arith.constant 0 : index
    %57 = vector.load %arg6[%c2_36, %c0_37, %c0_38] : memref<5x84x160xbf16, #tpu.memory_space<vmem>>, vector<1x84x160xbf16>
    %58 = vector.shape_cast %57 : vector<1x84x160xbf16> to vector<84x160xbf16>
    %59 = arith.truncf %56 : vector<80x84xf32> to vector<80x84xbf16>
    %cst_39 = arith.constant dense<0.000000e+00> : vector<80x160xf32>
    %60 = tpu.matmul %59, %58, %cst_39 {dimension_numbers = #tpu.dot_dimension_numbers<[1], [0], [0], [1], [0, 0, 1, 1], [], []>} : vector<80x84xbf16>, vector<84x160xbf16>, vector<80x160xf32> -> vector<80x160xf32>
    %61 = arith.addf %55, %60 : vector<80x160xf32>
    %62 = vector.extract_strided_slice %41 {offsets = [24, 0], sizes = [80, 84], strides = [1, 1]} : vector<112x84xf32> to vector<80x84xf32>
    %c3_40 = arith.constant 3 : index
    %c0_41 = arith.constant 0 : index
    %c0_42 = arith.constant 0 : index
    %63 = vector.load %arg6[%c3_40, %c0_41, %c0_42] : memref<5x84x160xbf16, #tpu.memory_space<vmem>>, vector<1x84x160xbf16>
    %64 = vector.shape_cast %63 : vector<1x84x160xbf16> to vector<84x160xbf16>
    %65 = arith.truncf %62 : vector<80x84xf32> to vector<80x84xbf16>
    %cst_43 = arith.constant dense<0.000000e+00> : vector<80x160xf32>
    %66 = tpu.matmul %65, %64, %cst_43 {dimension_numbers = #tpu.dot_dimension_numbers<[1], [0], [0], [1], [0, 0, 1, 1], [], []>} : vector<80x84xbf16>, vector<84x160xbf16>, vector<80x160xf32> -> vector<80x160xf32>
    %67 = arith.addf %61, %66 : vector<80x160xf32>
    %68 = vector.extract_strided_slice %41 {offsets = [32, 0], sizes = [80, 84], strides = [1, 1]} : vector<112x84xf32> to vector<80x84xf32>
    %c4_44 = arith.constant 4 : index
    %c0_45 = arith.constant 0 : index
    %c0_46 = arith.constant 0 : index
    %69 = vector.load %arg6[%c4_44, %c0_45, %c0_46] : memref<5x84x160xbf16, #tpu.memory_space<vmem>>, vector<1x84x160xbf16>
    %70 = vector.shape_cast %69 : vector<1x84x160xbf16> to vector<84x160xbf16>
    %71 = arith.truncf %68 : vector<80x84xf32> to vector<80x84xbf16>
    %cst_47 = arith.constant dense<0.000000e+00> : vector<80x160xf32>
    %72 = tpu.matmul %71, %70, %cst_47 {dimension_numbers = #tpu.dot_dimension_numbers<[1], [0], [0], [1], [0, 0, 1, 1], [], []>} : vector<80x84xbf16>, vector<84x160xbf16>, vector<80x160xf32> -> vector<80x160xf32>
    %73 = arith.addf %67, %72 : vector<80x160xf32>
    %cst_48 = arith.constant 0.000000e+00 : f32
    %74 = vector.broadcast %cst_48 : f32 to vector<80x160xf32>
    %75 = arith.maximumf %73, %74 : vector<80x160xf32>
    %c0_49 = arith.constant 0 : index
    %c0_50 = arith.constant 0 : index
    %76 = vector.load %arg8[%c0_49, %c0_50] : memref<40x80xbf16, #tpu.memory_space<vmem>>, vector<40x80xbf16>
    %77 = arith.truncf %75 : vector<80x160xf32> to vector<80x160xbf16>
    %cst_51 = arith.constant dense<0.000000e+00> : vector<40x160xf32>
    %78 = tpu.matmul %76, %77, %cst_51 {dimension_numbers = #tpu.dot_dimension_numbers<[1], [0], [0], [1], [0, 0, 1, 1], [], []>} : vector<40x80xbf16>, vector<80x160xbf16>, vector<40x160xf32> -> vector<40x160xf32>
    %c0_52 = arith.constant 0 : index
    %c0_53 = arith.constant 0 : index
    %79 = vector.load %arg9[%c0_52, %c0_53] : memref<160x80xbf16, #tpu.memory_space<vmem>>, vector<160x80xbf16>
    %80 = arith.truncf %78 : vector<40x160xf32> to vector<40x160xbf16>
    %cst_54 = arith.constant dense<0.000000e+00> : vector<40x80xf32>
    %81 = tpu.matmul %80, %79, %cst_54 {dimension_numbers = #tpu.dot_dimension_numbers<[1], [0], [0], [1], [0, 0, 1, 1], [], []>} : vector<40x160xbf16>, vector<160x80xbf16>, vector<40x80xf32> -> vector<40x80xf32>
    %82 = vector.extract_strided_slice %81 {offsets = [0, 0], sizes = [8, 80], strides = [1, 1]} : vector<40x80xf32> to vector<8x80xf32>
    %c0_55 = arith.constant 0 : index
    %c0_56 = arith.constant 0 : index
    %c0_57 = arith.constant 0 : index
    %83 = vector.load %arg10[%c0_55, %c0_56, %c0_57] : memref<5x80x120xbf16, #tpu.memory_space<vmem>>, vector<1x80x120xbf16>
    %84 = vector.shape_cast %83 : vector<1x80x120xbf16> to vector<80x120xbf16>
    %85 = arith.truncf %82 : vector<8x80xf32> to vector<8x80xbf16>
    %cst_58 = arith.constant dense<0.000000e+00> : vector<8x120xf32>
    %86 = tpu.matmul %85, %84, %cst_58 {dimension_numbers = #tpu.dot_dimension_numbers<[1], [0], [0], [1], [0, 0, 1, 1], [], []>} : vector<8x80xbf16>, vector<80x120xbf16>, vector<8x120xf32> -> vector<8x120xf32>
    %c0_59 = arith.constant 0 : index
    %c0_60 = arith.constant 0 : index
    %87 = vector.load %arg11[%c0_59, %c0_60] : memref<1x120xf32, #tpu.memory_space<vmem>>, vector<1x120xf32>
    %88 = vector.broadcast %87 : vector<1x120xf32> to vector<8x120xf32>
    %89 = arith.addf %86, %88 : vector<8x120xf32>
    %90 = vector.extract_strided_slice %81 {offsets = [8, 0], sizes = [8, 80], strides = [1, 1]} : vector<40x80xf32> to vector<8x80xf32>
    %c1_61 = arith.constant 1 : index
    %c0_62 = arith.constant 0 : index
    %c0_63 = arith.constant 0 : index
    %91 = vector.load %arg10[%c1_61, %c0_62, %c0_63] : memref<5x80x120xbf16, #tpu.memory_space<vmem>>, vector<1x80x120xbf16>
    %92 = vector.shape_cast %91 : vector<1x80x120xbf16> to vector<80x120xbf16>
    %93 = arith.truncf %90 : vector<8x80xf32> to vector<8x80xbf16>
    %cst_64 = arith.constant dense<0.000000e+00> : vector<8x120xf32>
    %94 = tpu.matmul %93, %92, %cst_64 {dimension_numbers = #tpu.dot_dimension_numbers<[1], [0], [0], [1], [0, 0, 1, 1], [], []>} : vector<8x80xbf16>, vector<80x120xbf16>, vector<8x120xf32> -> vector<8x120xf32>
    %95 = arith.addf %89, %94 : vector<8x120xf32>
    %96 = vector.extract_strided_slice %81 {offsets = [16, 0], sizes = [8, 80], strides = [1, 1]} : vector<40x80xf32> to vector<8x80xf32>
    %c2_65 = arith.constant 2 : index
    %c0_66 = arith.constant 0 : index
    %c0_67 = arith.constant 0 : index
    %97 = vector.load %arg10[%c2_65, %c0_66, %c0_67] : memref<5x80x120xbf16, #tpu.memory_space<vmem>>, vector<1x80x120xbf16>
    %98 = vector.shape_cast %97 : vector<1x80x120xbf16> to vector<80x120xbf16>
    %99 = arith.truncf %96 : vector<8x80xf32> to vector<8x80xbf16>
    %cst_68 = arith.constant dense<0.000000e+00> : vector<8x120xf32>
    %100 = tpu.matmul %99, %98, %cst_68 {dimension_numbers = #tpu.dot_dimension_numbers<[1], [0], [0], [1], [0, 0, 1, 1], [], []>} : vector<8x80xbf16>, vector<80x120xbf16>, vector<8x120xf32> -> vector<8x120xf32>
    %101 = arith.addf %95, %100 : vector<8x120xf32>
    %102 = vector.extract_strided_slice %81 {offsets = [24, 0], sizes = [8, 80], strides = [1, 1]} : vector<40x80xf32> to vector<8x80xf32>
    %c3_69 = arith.constant 3 : index
    %c0_70 = arith.constant 0 : index
    %c0_71 = arith.constant 0 : index
    %103 = vector.load %arg10[%c3_69, %c0_70, %c0_71] : memref<5x80x120xbf16, #tpu.memory_space<vmem>>, vector<1x80x120xbf16>
    %104 = vector.shape_cast %103 : vector<1x80x120xbf16> to vector<80x120xbf16>
    %105 = arith.truncf %102 : vector<8x80xf32> to vector<8x80xbf16>
    %cst_72 = arith.constant dense<0.000000e+00> : vector<8x120xf32>
    %106 = tpu.matmul %105, %104, %cst_72 {dimension_numbers = #tpu.dot_dimension_numbers<[1], [0], [0], [1], [0, 0, 1, 1], [], []>} : vector<8x80xbf16>, vector<80x120xbf16>, vector<8x120xf32> -> vector<8x120xf32>
    %107 = arith.addf %101, %106 : vector<8x120xf32>
    %108 = vector.extract_strided_slice %81 {offsets = [32, 0], sizes = [8, 80], strides = [1, 1]} : vector<40x80xf32> to vector<8x80xf32>
    %c4_73 = arith.constant 4 : index
    %c0_74 = arith.constant 0 : index
    %c0_75 = arith.constant 0 : index
    %109 = vector.load %arg10[%c4_73, %c0_74, %c0_75] : memref<5x80x120xbf16, #tpu.memory_space<vmem>>, vector<1x80x120xbf16>
    %110 = vector.shape_cast %109 : vector<1x80x120xbf16> to vector<80x120xbf16>
    %111 = arith.truncf %108 : vector<8x80xf32> to vector<8x80xbf16>
    %cst_76 = arith.constant dense<0.000000e+00> : vector<8x120xf32>
    %112 = tpu.matmul %111, %110, %cst_76 {dimension_numbers = #tpu.dot_dimension_numbers<[1], [0], [0], [1], [0, 0, 1, 1], [], []>} : vector<8x80xbf16>, vector<80x120xbf16>, vector<8x120xf32> -> vector<8x120xf32>
    %113 = arith.addf %107, %112 : vector<8x120xf32>
    %cst_77 = arith.constant 0.000000e+00 : f32
    %114 = vector.broadcast %cst_77 : f32 to vector<8x120xf32>
    %115 = arith.maximumf %113, %114 : vector<8x120xf32>
    %c0_78 = arith.constant 0 : index
    %c0_79 = arith.constant 0 : index
    %116 = vector.load %arg12[%c0_78, %c0_79] : memref<120x84xbf16, #tpu.memory_space<vmem>>, vector<120x84xbf16>
    %117 = arith.truncf %115 : vector<8x120xf32> to vector<8x120xbf16>
    %cst_80 = arith.constant dense<0.000000e+00> : vector<8x84xf32>
    %118 = tpu.matmul %117, %116, %cst_80 {dimension_numbers = #tpu.dot_dimension_numbers<[1], [0], [0], [1], [0, 0, 1, 1], [], []>} : vector<8x120xbf16>, vector<120x84xbf16>, vector<8x84xf32> -> vector<8x84xf32>
    %c0_81 = arith.constant 0 : index
    %c0_82 = arith.constant 0 : index
    %119 = vector.load %arg13[%c0_81, %c0_82] : memref<1x84xf32, #tpu.memory_space<vmem>>, vector<1x84xf32>
    %120 = vector.broadcast %119 : vector<1x84xf32> to vector<8x84xf32>
    %121 = arith.addf %118, %120 : vector<8x84xf32>
    %122 = math.tanh %121 : vector<8x84xf32>
    %cst_83 = arith.constant 1.751900e+00 : f32
    %123 = vector.broadcast %cst_83 : f32 to vector<8x84xf32>
    %124 = arith.mulf %122, %123 : vector<8x84xf32>
    %c0_84 = arith.constant 0 : index
    %c0_85 = arith.constant 0 : index
    %125 = vector.load %arg14[%c0_84, %c0_85] : memref<84x10xbf16, #tpu.memory_space<vmem>>, vector<84x10xbf16>
    %126 = arith.truncf %124 : vector<8x84xf32> to vector<8x84xbf16>
    %cst_86 = arith.constant dense<0.000000e+00> : vector<8x10xf32>
    %127 = tpu.matmul %126, %125, %cst_86 {dimension_numbers = #tpu.dot_dimension_numbers<[1], [0], [0], [1], [0, 0, 1, 1], [], []>} : vector<8x84xbf16>, vector<84x10xbf16>, vector<8x10xf32> -> vector<8x10xf32>
    %128 = arith.mulf %124, %124 : vector<8x84xf32>
    %cst_87 = arith.constant dense<0.000000e+00> : vector<8xf32>
    %129 = vector.multi_reduction <add>, %128, %cst_87 [1] : vector<8x84xf32> to vector<8xf32>
    %130 = vector.shape_cast %129 : vector<8xf32> to vector<8x1xf32>
    %cst_88 = arith.constant 2.000000e+00 : f32
    %131 = vector.broadcast %cst_88 : f32 to vector<8x10xf32>
    %132 = arith.mulf %131, %127 : vector<8x10xf32>
    %133 = vector.broadcast %130 : vector<8x1xf32> to vector<8x10xf32>
    %134 = arith.subf %133, %132 : vector<8x10xf32>
    %c0_89 = arith.constant 0 : index
    %c0_90 = arith.constant 0 : index
    %135 = vector.load %arg15[%c0_89, %c0_90] : memref<1x10xf32, #tpu.memory_space<vmem>>, vector<1x10xf32>
    %136 = vector.broadcast %135 : vector<1x10xf32> to vector<8x10xf32>
    %137 = arith.addf %134, %136 : vector<8x10xf32>
    %cst_91 = arith.constant -5.000000e-02 : f32
    %138 = vector.broadcast %cst_91 : f32 to vector<8x10xf32>
    %139 = arith.mulf %138, %137 : vector<8x10xf32>
    %140 = math.exp %139 : vector<8x10xf32>
    %c0_92 = arith.constant 0 : index
    %c0_93 = arith.constant 0 : index
    %c0_94 = arith.constant 0 : index
    %141 = vector.load %arg16[%c0_92, %c0_93, %c0_94] : memref<1x8x10xf32, #tpu.memory_space<vmem>>, vector<1x8x10xf32>
    %142 = vector.shape_cast %141 : vector<1x8x10xf32> to vector<8x10xf32>
    %143 = vector.shape_cast %140 : vector<8x10xf32> to vector<1x8x10xf32>
    tpu.vector_store %arg16[%c0_92, %c0_93, %c0_94], %143 {strides = array<i32>} : memref<1x8x10xf32, #tpu.memory_space<vmem>>, vector<1x8x10xf32>,
    return
  }
  func.func @transform_0(%arg0: i32) -> (i32, i32, i32) {
    %c0_i32 = arith.constant 0 : i32
    %c0_i32_0 = arith.constant 0 : i32
    %c0_i32_1 = arith.constant 0 : i32
    return %arg0, %c0_i32, %c0_i32_0 : i32, i32, i32
  }
  func.func @transform_1(%arg0: i32) -> (i32, i32, i32) {
    %c0_i32 = arith.constant 0 : i32
    %c0_i32_0 = arith.constant 0 : i32
    %c0_i32_1 = arith.constant 0 : i32
    %c0_i32_2 = arith.constant 0 : i32
    return %c0_i32, %c0_i32_0, %c0_i32_1 : i32, i32, i32
  }
  func.func @transform_2(%arg0: i32) -> (i32, i32) {
    %c0_i32 = arith.constant 0 : i32
    %c0_i32_0 = arith.constant 0 : i32
    %c0_i32_1 = arith.constant 0 : i32
    return %c0_i32, %c0_i32_0 : i32, i32
  }
  func.func @transform_3(%arg0: i32) -> (i32, i32) {
    %c0_i32 = arith.constant 0 : i32
    %c0_i32_0 = arith.constant 0 : i32
    %c0_i32_1 = arith.constant 0 : i32
    return %c0_i32, %c0_i32_0 : i32, i32
  }
  func.func @transform_4(%arg0: i32) -> (i32, i32) {
    %c0_i32 = arith.constant 0 : i32
    %c0_i32_0 = arith.constant 0 : i32
    %c0_i32_1 = arith.constant 0 : i32
    return %c0_i32, %c0_i32_0 : i32, i32
  }
  func.func @transform_5(%arg0: i32) -> (i32, i32, i32) {
    %c0_i32 = arith.constant 0 : i32
    %c0_i32_0 = arith.constant 0 : i32
    %c0_i32_1 = arith.constant 0 : i32
    %c0_i32_2 = arith.constant 0 : i32
    return %c0_i32, %c0_i32_0, %c0_i32_1 : i32, i32, i32
  }
  func.func @transform_6(%arg0: i32) -> (i32, i32) {
    %c0_i32 = arith.constant 0 : i32
    %c0_i32_0 = arith.constant 0 : i32
    %c0_i32_1 = arith.constant 0 : i32
    return %c0_i32, %c0_i32_0 : i32, i32
  }
  func.func @transform_7(%arg0: i32) -> (i32, i32) {
    %c0_i32 = arith.constant 0 : i32
    %c0_i32_0 = arith.constant 0 : i32
    %c0_i32_1 = arith.constant 0 : i32
    return %c0_i32, %c0_i32_0 : i32, i32
  }
  func.func @transform_8(%arg0: i32) -> (i32, i32) {
    %c0_i32 = arith.constant 0 : i32
    %c0_i32_0 = arith.constant 0 : i32
    %c0_i32_1 = arith.constant 0 : i32
    return %c0_i32, %c0_i32_0 : i32, i32
  }
  func.func @transform_9(%arg0: i32) -> (i32, i32, i32) {
    %c0_i32 = arith.constant 0 : i32
    %c0_i32_0 = arith.constant 0 : i32
    %c0_i32_1 = arith.constant 0 : i32
    %c0_i32_2 = arith.constant 0 : i32
    return %c0_i32, %c0_i32_0, %c0_i32_1 : i32, i32, i32
  }
  func.func @transform_10(%arg0: i32) -> (i32, i32) {
    %c0_i32 = arith.constant 0 : i32
    %c0_i32_0 = arith.constant 0 : i32
    %c0_i32_1 = arith.constant 0 : i32
    return %c0_i32, %c0_i32_0 : i32, i32
  }
  func.func @transform_11(%arg0: i32) -> (i32, i32) {
    %c0_i32 = arith.constant 0 : i32
    %c0_i32_0 = arith.constant 0 : i32
    %c0_i32_1 = arith.constant 0 : i32
    return %c0_i32, %c0_i32_0 : i32, i32
  }
  func.func @transform_12(%arg0: i32) -> (i32, i32) {
    %c0_i32 = arith.constant 0 : i32
    %c0_i32_0 = arith.constant 0 : i32
    %c0_i32_1 = arith.constant 0 : i32
    return %c0_i32, %c0_i32_0 : i32, i32
  }
  func.func @transform_13(%arg0: i32) -> (i32, i32) {
    %c0_i32 = arith.constant 0 : i32
    %c0_i32_0 = arith.constant 0 : i32
    %c0_i32_1 = arith.constant 0 : i32
    return %c0_i32, %c0_i32_0 : i32, i32
  }
  func.func @transform_14(%arg0: i32) -> (i32, i32) {
    %c0_i32 = arith.constant 0 : i32
    %c0_i32_0 = arith.constant 0 : i32
    %c0_i32_1 = arith.constant 0 : i32
    return %c0_i32, %c0_i32_0 : i32, i32
  }
  func.func @transform_15(%arg0: i32) -> (i32, i32, i32) {
    %c0_i32 = arith.constant 0 : i32
    %c0_i32_0 = arith.constant 0 : i32
    %c0_i32_1 = arith.constant 0 : i32
    return %arg0, %c0_i32, %c0_i32_0 : i32, i32, i32
  }
}

</mosaic_0001>

<bundles_post_ra>
// kernel: forward.1
= control target key start
LH: loop header
LB: loop body
LE: loop exit
PB: predicated region body
PF: predicated region fallthrough
CT: control target
= control target key end

     0   :  { %20 = vsyncpa [#allocation3], 0  ;;  %s6850_s0 = inlined_call_operand.vmem [shape: f32[2,256,32], index: 0, kind: input, shape index: {}]   ;;  %s6851_s1 = inlined_call_operand.vmem [shape: bf16[5,32,168], index: 1, kind: input, shape index: {}]   ;;  %s6852_s2 = inlined_call_operand.vmem [shape: f32[1,168], index: 2, kind: input, shape index: {}]   ;;  %s6853_s3 = inlined_call_operand.vmem [shape: bf16[112,224], index: 3, kind: input, shape index: {}]   ;;  %s6854_s4 = inlined_call_operand.vmem [shape: bf16[168,84], index: 4, kind: input, shape index: {}]   ;;  %s6855_s5 = inlined_call_operand.vmem [shape: bf16[5,84,160], index: 5, kind: input, shape index: {}]   ;;  %s6856_s6 = inlined_call_operand.vmem [shape: f32[1,160], index: 6, kind: input, shape index: {}]   ;;  %s6857_s7 = inlined_call_operand.vmem [shape: bf16[40,80], index: 7, kind: input, shape index: {}]   ;;  %s6858_s8 = inlined_call_operand.vmem [shape: bf16[160,80], index: 8, kind: input, shape index: {}]   ;;  %s6859_s9 = inlined_call_operand.vmem [shape: bf16[5,80,120], index: 9, kind: input, shape index: {}]   ;;  %s6860_s10 = inlined_call_operand.vmem [shape: f32[1,120], index: 10, kind: input, shape index: {}]   ;;  %s6861_s11 = inlined_call_operand.vmem [shape: bf16[120,84], index: 11, kind: input, shape index: {}]   ;;  %s6862_s12 = inlined_call_operand.vmem [shape: f32[1,84], index: 12, kind: input, shape index: {}]   ;;  %s6863_s13 = inlined_call_operand.vmem [shape: bf16[84,10], index: 13, kind: input, shape index: {}]   ;;  %s6864_s14 = inlined_call_operand.vmem [shape: f32[1,10], index: 14, kind: input, shape index: {}]   ;;  %s6865_s15 = inlined_call_operand.hbm [shape: f32[2,8,10], index: 15, kind: output, shape index: {}]  }
   0x1   :  { %22 = vsyncpa [#allocation3 + $0x1], 0  ;;  %s5647_s18 = smov 0   ;;  %s5649_s19 = smov 0  }
   0x2   :  { %s5651_s20 = smov 0   ;;  %s5653_s21 = smov 0  }
   0x3 LB: > { %6871 = sst [smem:[#allocation5_spill]] %s5549_s18  ;;  %s5668_s22 = sadd.s32 4294967295, %s5561_s21   ;;  %s5561_s21 = sphi %s5653_s21, %s6880_s21   ;;  %s5557_s20 = sphi %s5651_s20, %s6882_s20   ;;  %s5553_s19 = sphi %s5649_s19, %s6884_s19   ;;  %s5549_s18 = sphi %s5647_s18, %s6883_s18  }
   0x4   : > { %6872 = sst [smem:[#allocation6_spill]] %s5557_s20  ;;  %s4306_s23 = sadd.s32 4294967294, %s5561_s21  }
   0x5   : > { %s5672_s24 = sadd.s32 1, %s5561_s21   ;;  %s355_s25 = sadd.s32 1, %s5557_s20 }
   0x6   : > { %6873 = sst [smem:[#allocation7_spill]] %s5672_s24  ;;  %s352_s26 = ssub.s32 %s5561_s21, %s5672_s24 }
   0x7   : > { %p365_p0 = scmp.ne.s32.totalorder %s5557_s20, %s5553_s19  ;;  %p353_p1 = scmp.eq.s32.totalorder %s352_s26, 0 }
   0x8   : > { %p366_p2 = scmp.eq.s32.totalorder %s5668_s22, 1  ;;  %p371_p3 = scmp.ne.s32.totalorder %s5553_s19, %s5549_s18 }
   0x9   : > { %p372_p4 = scmp.eq.s32.totalorder %s4306_s23, 1  ;;  %p4309_p7 = scmp.ge.s32.totalorder %s5561_s21, 1 }
   0xa   : > { %s5683_s27 = scalar_select %p353_p1, %s5557_s20, %s355_s25  }
   0xb   : > { %p5685_p5 = por %p366_p2, %p365_p0  ;;  %p5689_p6 = por %p372_p4, %p371_p3 }
   0xc   : > { %6874 = sst [smem:[#allocation8_spill]] %s5683_s27  ;;  %p440_p8 = scmp.lt.s32.totalorder %s5561_s21, 3 }
   0xd   : > { %s6876_s29 = scalar_select %p5689_p6, 1, 0 }
   0xe   : > { %p441_p9 = pnand %p4309_p7, %p440_p8 }
   0xf   : > { %6877 = sst [smem:[#allocation9_spill]] %s6876_s29  ;;  %v5296_v0 = vld [vmem:[%s6851_s1 + $0x4] ss:$8 sps:$4 sm:$0xff] (!%p441_p9)   ;;  %p488_p10 = scmp.lt.s32.totalorder (!%p441_p9), %s5668_s22, 1  ;;  %v5298_v1 = vld [vmem:[%s6851_s1] ss:$8 sps:$4 sm:$0xff] (!%p441_p9)  }
  0x10   : > { %444 = sbr.rel (%p441_p9) target bundleno = 2864 (0xb30), region = 80  ;;  %v5563_v2 = vmov (!%p441_p9), 0   ;;  %619 = vmatprep.subr.bf16.mxu0 (!%p441_p9), %v5296_v0  ;;  %v5299_v3 = vld [vmem:[%s6851_s1 + $0x14] ss:$8 sps:$4 sm:$0xff] (!%p441_p9)   ;;  %v5301_v4 = vld [vmem:[%s6851_s1 + $0x10] ss:$8 sps:$4 sm:$0xff] (!%p441_p9)  }
  0x11   : > { %651 = vmatprep.mubr.bf16.mxu0 (!%p441_p9), %v5563_v2  ;;  %620 = vmatpush1.bf16.msra.mxu0 (!%p441_p9), %v5298_v1  ;;  %v5304_v5 = vld [vmem:[%s6851_s1 + $0x24] ss:$8 sps:$4 sm:$0xff] (!%p441_p9)   ;;  %vm576_vm0 = vcmask (!%p441_p9), 261120   ;;  %v5302_v10 = vld [vmem:[%s6851_s1 + $0x20] ss:$8 sps:$4 sm:$0xff] (!%p441_p9)   ;;  %vm2037_vm1 = vcmask (!%p441_p9), 785408  }
  0x12   : > { %621 = vmatprep.subr.bf16.mxu0 (!%p441_p9), %v5299_v3  ;;  %v5307_v16 = vld [vmem:[%s6851_s1 + $0x34] ss:$8 sps:$4 sm:$0xff] (!%p441_p9)   ;;  %v5305_v21 = vld [vmem:[%s6851_s1 + $0x30] ss:$8 sps:$4 sm:$0xff] (!%p441_p9)   ;;  %v5310_v24 = vld [vmem:[%s6851_s1 + $0x44] ss:$8 sps:$4 sm:$0xff] (!%p441_p9)  }
  0x13   : > { %v5308_v0 = vld [vmem:[%s6851_s1 + $0x40] ss:$8 sps:$4 sm:$0xff] (!%p441_p9)   ;;  %v5313_v1 = vld [vmem:[%s6851_s1 + $0x54] ss:$8 sps:$4 sm:$0xff] (!%p441_p9)   ;;  %v5311_v3 = vld [vmem:[%s6851_s1 + $0x50] ss:$8 sps:$4 sm:$0xff] (!%p441_p9)  }
  0x14   : > { %vm2282_vm2 = vcmask (!%p441_p9), 1043456   ;;  %vm2260_vm3 = vcmask (!%p441_p9), 326656   ;;  %vm2474_vm4 = vcmask (!%p441_p9), 1041408   ;;  %vm2458_vm5 = vcmask (!%p441_p9), 687104   ;;  %s485_s23 = sand.u32 (!%p441_p9), 1, %s5553_s19   ;;  %s4701_s24 = sshll.u32 (!%p441_p9), %s5668_s22, 7 }
  0x15   : > { %622 = vmatpush1.bf16.msra.mxu0 (!%p441_p9), %v5301_v4  ;;  %v5316_v4 = vld [vmem:[%s6851_s1 + $0x64] ss:$8 sps:$4 sm:$0xff] (!%p441_p9)   ;;  %vm3348_vm6 = vcmask (!%p441_p9), 654336   ;;  %vm5565_vm7 = vmmov (!%p441_p9), 0   ;;  %vm4074_vm8 = vcmask (!%p441_p9), 982016   ;;  %s4310_s20 = sshll.u32 (!%p441_p9), %s485_s23, 3  ;;  %s6808_s26 = scalar_lea.hbm (!%p441_p9), %s6865_s15, %s4701_s24 }
  0x16   : > { %873 = vmatprep.subr.bf16.mxu0 (!%p441_p9), %v5304_v5  ;;  %vm4231_vm9 = vcmask (!%p441_p9), 80896   ;;  %s4234_s30 = scalar_lea.sflag (!%p441_p9), [#allocation3], %s485_s23 }
  0x17   : > { %s489_s27 = scalar_select %p488_p10, %s5668_s22, 1 }
  0x18   : > { %s5566_s22 = smov [#allocation2]  }
  0x19   : > { %s4704_s16 = sshll.u32 %s489_s27, 8  ;;  %s487_s27 = scalar_lea.vmem [#allocation2], %s4310_s20 }
  0x1a   : > { %s5716_s18 = scalar_lea.vmem %s6850_s0, %s4704_s16  ;;  %s4247_s29 = sshll.u32 %s487_s27, 4  ;;  %s6810_s29 = int_to_ptr.vmem [resolvable:$true] %s4247_s29 }
  0x1b   : > { %v494_v6 = vld [vmem:[%s5716_s18] sm:$0xff]  ;;  %v5720_v7 = vld [vmem:[%s5716_s18 + $0x8] sm:$0xff]  ;;  %v5723_v8 = vld [vmem:[%s5716_s18 + $0x10] sm:$0xff]  ;;  %s5499_s16 = scalar_lea.vmem %s6810_s29, 128  ;;  %s5503_s17 = sshll.u32 %s5566_s22, 4  ;;  %s5504_s17 = int_to_ptr.vmem [resolvable:$false] %s5503_s17 }
  0x1c   : > { %v530_v9 = vpack.c.bf16 %v5720_v7, %v494_v6  ;;  %v497_v11 = vld [vmem:[%s5716_s18 + $0x18] sm:$0xff]  ;;  %v797_v12 = vpack.c.bf16 %v5723_v8, %v5720_v7  ;;  %v498_v13 = vld [vmem:[%s5716_s18 + $0x20] sm:$0xff]  ;;  %v499_v14 = vld [vmem:[%s5716_s18 + $0x28] sm:$0xff]  ;;  %p5500_p11 = scmp.ne.s32.totalorder %s6810_s29, %s5499_s16  ;;  %s5505_s20 = scalar_lea.vmem %s5504_s17, 256 }
  0x1d   : > { %v500_v15 = vld [vmem:[%s5716_s18 + $0x30] sm:$0xff]  ;;  %v5738_v17 = vpack.c.bf16 %v498_v13, %v497_v11  ;;  %v501_v19 = vld [vmem:[%s5716_s18 + $0x38] sm:$0xff]  ;;  %v502_v20 = vld [vmem:[%s5716_s18 + $0x40] sm:$0xff]  ;;  %v5752_v23 = vpack.c.bf16 %v497_v11, %v5723_v8  ;;  %v5764_v28 = vpack.c.bf16 %v499_v14, %v498_v13  ;;  %p5506_p0 = scmp.lt.s32.totalorder %s6810_s29, %s5504_s17  ;;  %p5507_p1 = scmp.lt.s32.totalorder %s5505_s20, %s5499_s16 }
  0x1e   : > { %v5740_v18 = vpack.c.bf16 %v500_v15, %v499_v14  ;;  %4317 = vmatmul.mubr.msk.bf16.vlgmr.msra.gmra.mrb[0].mxu0 %vm576_vm0, %v530_v9  ;;  %v5749_v22 = vpack.c.bf16 %v502_v20, %v501_v19  ;;  %v503_v25 = vld [vmem:[%s5716_s18 + $0x48] sm:$0xff]  ;;  %v504_v26 = vld [vmem:[%s5716_s18 + $0x50] sm:$0xff]  ;;  %v505_v29 = vld [vmem:[%s5716_s18 + $0x58] sm:$0xff]  ;;  %v5773_v32 = vpack.c.bf16 %v501_v19, %v500_v15  ;;  %p5501_p12 = pnand %p5500_p11, %p5685_p5 }
  0x1f   : > { %874 = vmatpush1.bf16.msra.mxu0 %v5302_v10  ;;  %661 = vmatprep.mubr.bf16.mxu0 %v5563_v2  ;;  %v5762_v27 = vpack.c.bf16 %v504_v26, %v503_v25  ;;  %v506_v30 = vld [vmem:[%s5716_s18 + $0x60] sm:$0xff]  ;;  %v507_v33 = vld [vmem:[%s5716_s18 + $0x68] sm:$0xff]  ;;  %v508_v34 = vld [vmem:[%s5716_s18 + $0x70] sm:$0xff]  ;;  %v5782_v36 = vpack.c.bf16 %v503_v25, %v502_v20  ;;  %v5791_v40 = vpack.c.bf16 %v505_v29, %v504_v26  ;;  %p5508_p2 = por %p5507_p1, %p5506_p0 }
  0x20   : > { %875 = vmatprep.subr.bf16.mxu0 %v5307_v16  ;;  %v5771_v31 = vpack.c.bf16 %v506_v30, %v505_v29  ;;  %v5780_v35 = vpack.c.bf16 %v508_v34, %v507_v33  ;;  %v509_v37 = vld [vmem:[%s5716_s18 + $0x78] sm:$0xff]  ;;  %v510_v38 = vld [vmem:[%s5716_s18 + $0x80] sm:$0xff]  ;;  %v511_v41 = vld [vmem:[%s5716_s18 + $0x88] sm:$0xff]  ;;  %v5800_v44 = vpack.c.bf16 %v507_v33, %v506_v30  ;;  %p5502_p13 = pneg %p5501_p12 }
  0x21   : > { %v5789_v39 = vpack.c.bf16 %v510_v38, %v509_v37  ;;  %v512_v42 = vld [vmem:[%s5716_s18 + $0x90] sm:$0xff]  ;;  %v513_v45 = vld [vmem:[%s5716_s18 + $0x98] sm:$0xff]  ;;  %v514_v46 = vld [vmem:[%s5716_s18 + $0xa0] sm:$0xff]  ;;  %v5809_v48 = vpack.c.bf16 %v509_v37, %v508_v34  ;;  %v5818_v52 = vpack.c.bf16 %v511_v41, %v510_v38 }
  0x22   : > { %v5798_v43 = vpack.c.bf16 %v512_v42, %v511_v41  ;;  %v5807_v47 = vpack.c.bf16 %v514_v46, %v513_v45  ;;  %v515_v49 = vld [vmem:[%s5716_s18 + $0xa8] sm:$0xff]  ;;  %v516_v50 = vld [vmem:[%s5716_s18 + $0xb0] sm:$0xff]  ;;  %v517_v53 = vld [vmem:[%s5716_s18 + $0xb8] sm:$0xff]  ;;  %v5827_v56 = vpack.c.bf16 %v513_v45, %v512_v42  ;;  %p5509_p3 = pnand %p5508_p2, %p5502_p13 }
  0x23   : > { %876 = vmatpush1.bf16.msra.mxu0 %v5305_v21  ;;  %v5816_v51 = vpack.c.bf16 %v516_v50, %v515_v49  ;;  %v518_v54 = vld [vmem:[%s5716_s18 + $0xc0] sm:$0xff]  ;;  %v5832_v57 = vpack.c.bf16 %v515_v49, %v514_v46  ;;  %v5837_v58 = vpack.c.bf16 %v517_v53, %v516_v50  ;;  %v519_v59 = vld [vmem:[%s5716_s18 + $0xc8] sm:$0xff]  ;;  %v520_v61 = vld [vmem:[%s5716_s18 + $0xd0] sm:$0xff]  ;;  %v546_v21 = vlaneseq }
  0x24   : > { %1131 = vmatprep.subr.bf16.mxu0 %v5310_v24  ;;  %v5825_v55 = vpack.c.bf16 %v518_v54, %v517_v53  ;;  %v5843_v60 = vpack.c.bf16 %v519_v59, %v518_v54  ;;  %v521_v62 = vld [vmem:[%s5716_s18 + $0xd8] sm:$0xff]  ;;  %v5905_v5 = vpack.c.bf16 %v520_v61, %v519_v59  ;;  %v522_v6 = vld [vmem:[%s5716_s18 + $0xe0] sm:$0xff] }
  0x25   : > { %v5850_v63 = vpack.c.bf16 %v521_v62, %v520_v61  ;;  %v5911_v7 = vpack.c.bf16 %v522_v6, %v521_v62  ;;  %v5314_v8 = vld [vmem:[%s6851_s1 + $0x60] ss:$8 sps:$4 sm:$0xff]   ;;  %v5319_v9 = vld [vmem:[%s6851_s1 + $0x74] ss:$8 sps:$4 sm:$0xff]   ;;  %v5317_v10 = vld [vmem:[%s6851_s1 + $0x70] ss:$8 sps:$4 sm:$0xff]  }
  0x26   : > { %4318 = vmatmul.mubr.msk.bf16.gmra.mrb[4].mxu0 %vm576_vm0, %v5752_v23  ;;  %v5322_v11 = vld [vmem:[%s6851_s1 + $0x84] ss:$8 sps:$4 sm:$0xff]   ;;  %v5320_v14 = vld [vmem:[%s6851_s1 + $0x80] ss:$8 sps:$4 sm:$0xff]   ;;  %v5325_v15 = vld [vmem:[%s6851_s1 + $0x94] ss:$8 sps:$4 sm:$0xff]  }
  0x27   : > { %671 = vmatprep.mubr.bf16.mxu0 %v5563_v2  ;;  %v5323_v16 = vld [vmem:[%s6851_s1 + $0x90] ss:$8 sps:$4 sm:$0xff]   ;;  %v544_v25 = vld [vmem:[%s6852_s2] sm:$0x3] }
  0x28   : > { %v525_v19 = vld [vmem:[%s5716_s18 + $0xf8] sm:$0xff] }
  0x2e   : > { %4319 = vmatmul.mubr.msk.bf16.gmra.mrb[8].mxu0 %vm576_vm0, %v5764_v28 }
  0x2f   : > { %681 = vmatprep.mubr.bf16.mxu0 %v5563_v2 }
  0x36   : > { %4320 = vmatmul.mubr.msk.bf16.gmra.mrb[12].mxu0 %vm576_vm0, %v5773_v32 }
  0x37   : > { %691 = vmatprep.mubr.bf16.mxu0 %v5563_v2 }
  0x3e   : > { %4321 = vmatmul.mubr.msk.bf16.gmra.mrb[16].mxu0 %vm576_vm0, %v5782_v36 }
  0x3f   : > { %701 = vmatprep.mubr.bf16.mxu0 %v5563_v2 }
  0x46   : > { %4322 = vmatmul.mubr.msk.bf16.gmra.mrb[20].mxu0 %vm576_vm0, %v5791_v40 }
  0x47   : > { %711 = vmatprep.mubr.bf16.mxu0 %v5563_v2 }
  0x4e   : > { %4323 = vmatmul.mubr.msk.bf16.gmra.mrb[24].mxu0 %vm576_vm0, %v5800_v44 }
  0x4f   : > { %721 = vmatprep.mubr.bf16.mxu0 %v5563_v2 }
  0x56   : > { %4324 = vmatmul.mubr.msk.bf16.gmra.mrb[28].mxu0 %vm576_vm0, %v5809_v48 }
  0x57   : > { %731 = vmatprep.mubr.bf16.mxu0 %v5563_v2 }
  0x5e   : > { %4325 = vmatmul.mubr.msk.bf16.gmra.mrb[32].mxu0 %vm576_vm0, %v5818_v52 }
  0x5f   : > { %741 = vmatprep.mubr.bf16.mxu0 %v5563_v2 }
  0x66   : > { %4326 = vmatmul.mubr.msk.bf16.gmra.mrb[36].mxu0 %vm576_vm0, %v5827_v56 }
  0x67   : > { %751 = vmatprep.mubr.bf16.mxu0 %v5563_v2 }
  0x6e   : > { %4327 = vmatmul.mubr.msk.bf16.gmra.mrb[40].mxu0 %vm576_vm0, %v5832_v57 }
  0x6f   : > { %761 = vmatprep.mubr.bf16.mxu0 %v5563_v2 }
  0x76   : > { %4328 = vmatmul.mubr.msk.bf16.gmra.mrb[44].mxu0 %vm576_vm0, %v5837_v58 }
  0x77   : > { %771 = vmatprep.mubr.bf16.mxu0 %v5563_v2 }
  0x7e   : > { %4329 = vmatmul.mubr.msk.bf16.gmra.mrb[48].mxu0 %vm576_vm0, %v5843_v60 }
  0x7f   : > { %781 = vmatprep.mubr.bf16.mxu0 %v5563_v2 }
  0x86   : > { %4330 = vmatmul.mubr.msk.bf16.gmra.mrb[52].mxu0 %vm576_vm0, %v5850_v63 }
  0x87   : > { %905 = vmatprep.mubr.bf16.mxu0 %v5563_v2 }
  0x8e   : > { %4339 = vmatmul.mubr.msk.bf16.vlgmr.msra.gmra.mrb[0].mxu0 %vm576_vm0, %v797_v12  ;;  %v523_v12 = vld [vmem:[%s5716_s18 + $0xe8] sm:$0xff] }
  0x8f   : > { %1132 = vmatpush1.bf16.msra.mxu0 %v5308_v0  ;;  %915 = vmatprep.mubr.bf16.mxu0 %v5563_v2  ;;  %v5968_v13 = vpack.c.bf16 %v523_v12, %v522_v6 }
  0x90   : > { %1133 = vmatprep.subr.bf16.mxu0 %v5313_v1 }
  0x93   : > { %1134 = vmatpush1.bf16.msra.mxu0 %v5311_v3 }
  0x94   : > { %1389 = vmatprep.subr.bf16.mxu0 %v5316_v4 }
  0x96   : > { %4340 = vmatmul.mubr.msk.bf16.gmra.mrb[4].mxu0 %vm576_vm0, %v5738_v17 }
  0x97   : > { %925 = vmatprep.mubr.bf16.mxu0 %v5563_v2 }
  0x9e   : > { %4341 = vmatmul.mubr.msk.bf16.gmra.mrb[8].mxu0 %vm576_vm0, %v5740_v18 }
  0x9f   : > { %935 = vmatprep.mubr.bf16.mxu0 %v5563_v2 }
  0xa6   : > { %4342 = vmatmul.mubr.msk.bf16.gmra.mrb[12].mxu0 %vm576_vm0, %v5749_v22 }
  0xa7   : > { %945 = vmatprep.mubr.bf16.mxu0 %v5563_v2 }
  0xae   : > { %4343 = vmatmul.mubr.msk.bf16.gmra.mrb[16].mxu0 %vm576_vm0, %v5762_v27 }
  0xaf   : > { %955 = vmatprep.mubr.bf16.mxu0 %v5563_v2 }
  0xb6   : > { %4344 = vmatmul.mubr.msk.bf16.gmra.mrb[20].mxu0 %vm576_vm0, %v5771_v31 }
  0xb7   : > { %965 = vmatprep.mubr.bf16.mxu0 %v5563_v2 }
  0xbe   : > { %4345 = vmatmul.mubr.msk.bf16.gmra.mrb[24].mxu0 %vm576_vm0, %v5780_v35 }
  0xbf   : > { %975 = vmatprep.mubr.bf16.mxu0 %v5563_v2 }
  0xc6   : > { %4346 = vmatmul.mubr.msk.bf16.gmra.mrb[28].mxu0 %vm576_vm0, %v5789_v39 }
  0xc7   : > { %985 = vmatprep.mubr.bf16.mxu0 %v5563_v2 }
  0xce   : > { %4347 = vmatmul.mubr.msk.bf16.gmra.mrb[32].mxu0 %vm576_vm0, %v5798_v43 }
  0xcf   : > { %995 = vmatprep.mubr.bf16.mxu0 %v5563_v2 }
  0xd6   : > { %4348 = vmatmul.mubr.msk.bf16.gmra.mrb[36].mxu0 %vm576_vm0, %v5807_v47 }
  0xd7   : > { %1005 = vmatprep.mubr.bf16.mxu0 %v5563_v2 }
  0xde   : > { %4349 = vmatmul.mubr.msk.bf16.gmra.mrb[40].mxu0 %vm576_vm0, %v5816_v51 }
  0xdf   : > { %1015 = vmatprep.mubr.bf16.mxu0 %v5563_v2 }
  0xe6   : > { %4350 = vmatmul.mubr.msk.bf16.gmra.mrb[44].mxu0 %vm576_vm0, %v5825_v55 }
  0xe7   : > { %1025 = vmatprep.mubr.bf16.mxu0 %v5563_v2 }
  0xee   : > { %4351 = vmatmul.mubr.msk.bf16.gmra.mrb[48].mxu0 %vm576_vm0, %v5905_v5 }
  0xef   : > { %1035 = vmatprep.mubr.bf16.mxu0 %v5563_v2 }
  0xf6   : > { %4352 = vmatmul.mubr.msk.bf16.gmra.mrb[52].mxu0 %vm576_vm0, %v5911_v7 }
  0xf7   : > { %1163 = vmatprep.mubr.bf16.mxu0 %v5563_v2 }
  0xfe   : > { %4361 = vmatmul.mubr.msk.bf16.vlgmr.msra.gmra.mrb[0].mxu0 %vm576_vm0, %v5752_v23  ;;  %v6068_v23 = vshrl.u32 %v546_v21, 7 }
  0xff   : > { %1390 = vmatpush1.bf16.msra.mxu0 %v5314_v8  ;;  %1173 = vmatprep.mubr.bf16.mxu0 %v5563_v2 }
 0x100   : > { %1391 = vmatprep.subr.bf16.mxu0 %v5319_v9  ;;  %v548_v24 = vsub.s32 0, %v6068_v23  ;;  %v552_v26 = vsub.s32 1, %v6068_v23 }
 0x103   : > { %1392 = vmatpush1.bf16.msra.mxu0 %v5317_v10 }
 0x104   : > { %1647 = vmatprep.subr.bf16.mxu0 %v5322_v11 }
 0x106   : > { %4362 = vmatmul.mubr.msk.bf16.gmra.mrb[4].mxu0 %vm576_vm0, %v5764_v28 }
 0x107   : > { %1183 = vmatprep.mubr.bf16.mxu0 %v5563_v2 }
 0x10e   : > { %4363 = vmatmul.mubr.msk.bf16.gmra.mrb[8].mxu0 %vm576_vm0, %v5773_v32 }
 0x10f   : > { %1193 = vmatprep.mubr.bf16.mxu0 %v5563_v2 }
 0x116   : > { %4364 = vmatmul.mubr.msk.bf16.gmra.mrb[12].mxu0 %vm576_vm0, %v5782_v36 }
 0x117   : > { %1203 = vmatprep.mubr.bf16.mxu0 %v5563_v2 }
 0x11e   : > { %4365 = vmatmul.mubr.msk.bf16.gmra.mrb[16].mxu0 %vm576_vm0, %v5791_v40 }
 0x11f   : > { %1213 = vmatprep.mubr.bf16.mxu0 %v5563_v2 }
 0x126   : > { %4366 = vmatmul.mubr.msk.bf16.gmra.mrb[20].mxu0 %vm576_vm0, %v5800_v44 }
 0x127   : > { %1223 = vmatprep.mubr.bf16.mxu0 %v5563_v2 }
 0x12e   : > { %4367 = vmatmul.mubr.msk.bf16.gmra.mrb[24].mxu0 %vm576_vm0, %v5809_v48 }
 0x12f   : > { %1233 = vmatprep.mubr.bf16.mxu0 %v5563_v2 }
 0x136   : > { %4368 = vmatmul.mubr.msk.bf16.gmra.mrb[28].mxu0 %vm576_vm0, %v5818_v52 }
 0x137   : > { %1243 = vmatprep.mubr.bf16.mxu0 %v5563_v2 }
 0x13e   : > { %4369 = vmatmul.mubr.msk.bf16.gmra.mrb[32].mxu0 %vm576_vm0, %v5827_v56 }
 0x13f   : > { %1253 = vmatprep.mubr.bf16.mxu0 %v5563_v2 }
 0x146   : > { %4370 = vmatmul.mubr.msk.bf16.gmra.mrb[36].mxu0 %vm576_vm0, %v5832_v57 }
 0x147   : > { %1263 = vmatprep.mubr.bf16.mxu0 %v5563_v2 }
 0x14e   : > { %4371 = vmatmul.mubr.msk.bf16.gmra.mrb[40].mxu0 %vm576_vm0, %v5837_v58 }
 0x14f   : > { %1273 = vmatprep.mubr.bf16.mxu0 %v5563_v2 }
 0x156   : > { %4372 = vmatmul.mubr.msk.bf16.gmra.mrb[44].mxu0 %vm576_vm0, %v5843_v60 }
 0x157   : > { %1283 = vmatprep.mubr.bf16.mxu0 %v5563_v2 }
 0x15e   : > { %4373 = vmatmul.mubr.msk.bf16.gmra.mrb[48].mxu0 %vm576_vm0, %v5850_v63 }
 0x15f   : > { %1293 = vmatprep.mubr.bf16.mxu0 %v5563_v2 }
 0x166   : > { %4374 = vmatmul.mubr.msk.bf16.gmra.mrb[52].mxu0 %vm576_vm0, %v5968_v13 }
 0x167   : > { %1421 = vmatprep.mubr.bf16.mxu0 %v5563_v2 }
 0x16e   : > { %4383 = vmatmul.mubr.msk.bf16.vlgmr.msra.gmra.mrb[0].mxu0 %vm576_vm0, %v5738_v17  ;;  %v524_v17 = vld [vmem:[%s5716_s18 + $0xf0] sm:$0xff] }
 0x16f   : > { %1648 = vmatpush1.bf16.msra.mxu0 %v5320_v14  ;;  %1431 = vmatprep.mubr.bf16.mxu0 %v5563_v2  ;;  %v1623_v20 = vpack.c.bf16 %v525_v19, %v524_v17 }
 0x170   : > { %1649 = vmatprep.subr.bf16.mxu0 %v5325_v15 }
 0x173   : > { %1650 = vmatpush1.bf16.msra.mxu0 %v5323_v16 }
 0x176   : > { %4384 = vmatmul.mubr.msk.bf16.gmra.mrb[4].mxu0 %vm576_vm0, %v5740_v18  ;;  %v1365_v18 = vpack.c.bf16 %v524_v17, %v523_v12 }
 0x177   : > { %1441 = vmatprep.mubr.bf16.mxu0 %v5563_v2 }
 0x17e   : > { %4385 = vmatmul.mubr.msk.bf16.gmra.mrb[8].mxu0 %vm576_vm0, %v5749_v22  ;;  %v5328_v22 = vld [vmem:[%s6853_s3 + $0x4] ss:$8 sps:$4 sm:$0xff]  }
 0x17f   : > { %1451 = vmatprep.mubr.bf16.mxu0 %v5563_v2  ;;  %4433 = vmatprep.mubr.msk.bf16.mxu1 %vm2037_vm1, %v5328_v22 }
 0x186   : > { %4386 = vmatmul.mubr.msk.bf16.gmra.mrb[12].mxu0 %vm576_vm0, %v5762_v27  ;;  %v6078_v27 = vrot.slane %v544_v25, %v548_v24 }
 0x187   : > { %1461 = vmatprep.mubr.bf16.mxu0 %v5563_v2 }
 0x18e   : > { %4387 = vmatmul.mubr.msk.bf16.gmra.mrb[16].mxu0 %vm576_vm0, %v5771_v31 }
 0x18f   : > { %1471 = vmatprep.mubr.bf16.mxu0 %v5563_v2 }
 0x196   : > { %4388 = vmatmul.mubr.msk.bf16.gmra.mrb[20].mxu0 %vm576_vm0, %v5780_v35 }
 0x197   : > { %1481 = vmatprep.mubr.bf16.mxu0 %v5563_v2 }
 0x19e   : > { %4389 = vmatmul.mubr.msk.bf16.gmra.mrb[24].mxu0 %vm576_vm0, %v5789_v39 }
 0x19f   : > { %1491 = vmatprep.mubr.bf16.mxu0 %v5563_v2 }
 0x1a6   : > { %4390 = vmatmul.mubr.msk.bf16.gmra.mrb[28].mxu0 %vm576_vm0, %v5798_v43 }
 0x1a7   : > { %1501 = vmatprep.mubr.bf16.mxu0 %v5563_v2 }
 0x1ae   : > { %4391 = vmatmul.mubr.msk.bf16.gmra.mrb[32].mxu0 %vm576_vm0, %v5807_v47 }
 0x1af   : > { %1511 = vmatprep.mubr.bf16.mxu0 %v5563_v2 }
 0x1b6   : > { %4392 = vmatmul.mubr.msk.bf16.gmra.mrb[36].mxu0 %vm576_vm0, %v5816_v51 }
 0x1b7   : > { %1521 = vmatprep.mubr.bf16.mxu0 %v5563_v2 }
 0x1be   : > { %4393 = vmatmul.mubr.msk.bf16.gmra.mrb[40].mxu0 %vm576_vm0, %v5825_v55 }
 0x1bf   : > { %1531 = vmatprep.mubr.bf16.mxu0 %v5563_v2 }
 0x1c6   : > { %4394 = vmatmul.mubr.msk.bf16.gmra.mrb[44].mxu0 %vm576_vm0, %v5905_v5 }
 0x1c7   : > { %1541 = vmatprep.mubr.bf16.mxu0 %v5563_v2 }
 0x1ce   : > { %4395 = vmatmul.mubr.msk.bf16.gmra.mrb[48].mxu0 %vm576_vm0, %v5911_v7 }
 0x1cf   : > { %1551 = vmatprep.mubr.bf16.mxu0 %v5563_v2 }
 0x1d6   : > { %4396 = vmatmul.mubr.msk.bf16.gmra.mrb[52].mxu0 %vm576_vm0, %v1365_v18 }
 0x1d7   : > { %1679 = vmatprep.mubr.bf16.mxu0 %v5563_v2 }
 0x1de   : > { %4405 = vmatmul.mubr.msk.bf16.vlgmr.msra.gmra.mrb[0].mxu0 %vm576_vm0, %v5764_v28  ;;  %v6082_v28 = vrot.slane %v544_v25, %v552_v26 }
 0x1df   : > { %1689 = vmatprep.mubr.bf16.mxu0 %v5563_v2 }
 0x1e6   : > { %4406 = vmatmul.mubr.msk.bf16.gmra.mrb[4].mxu0 %vm576_vm0, %v5773_v32 }
 0x1e7   : > { %1699 = vmatprep.mubr.bf16.mxu0 %v5563_v2 }
 0x1ee   : > { %4407 = vmatmul.mubr.msk.bf16.gmra.mrb[8].mxu0 %vm576_vm0, %v5782_v36 }
 0x1ef   : > { %1709 = vmatprep.mubr.bf16.mxu0 %v5563_v2 }
 0x1f6   : > { %4408 = vmatmul.mubr.msk.bf16.gmra.mrb[12].mxu0 %vm576_vm0, %v5791_v40 }
 0x1f7   : > { %1719 = vmatprep.mubr.bf16.mxu0 %v5563_v2 }
 0x1fe   : > { %4409 = vmatmul.mubr.msk.bf16.gmra.mrb[16].mxu0 %vm576_vm0, %v5800_v44 }
 0x1ff   : > { %1729 = vmatprep.mubr.bf16.mxu0 %v5563_v2 }
 0x206   : > { %4410 = vmatmul.mubr.msk.bf16.gmra.mrb[20].mxu0 %vm576_vm0, %v5809_v48 }
 0x207   : > { %1739 = vmatprep.mubr.bf16.mxu0 %v5563_v2 }
 0x20e   : > { %4411 = vmatmul.mubr.msk.bf16.gmra.mrb[24].mxu0 %vm576_vm0, %v5818_v52 }
 0x20f   : > { %1749 = vmatprep.mubr.bf16.mxu0 %v5563_v2 }
 0x216   : > { %4412 = vmatmul.mubr.msk.bf16.gmra.mrb[28].mxu0 %vm576_vm0, %v5827_v56 }
 0x217   : > { %1759 = vmatprep.mubr.bf16.mxu0 %v5563_v2 }
 0x21e   : > { %4413 = vmatmul.mubr.msk.bf16.gmra.mrb[32].mxu0 %vm576_vm0, %v5832_v57 }
 0x21f   : > { %1769 = vmatprep.mubr.bf16.mxu0 %v5563_v2 }
 0x226   : > { %4414 = vmatmul.mubr.msk.bf16.gmra.mrb[36].mxu0 %vm576_vm0, %v5837_v58 }
 0x227   : > { %1779 = vmatprep.mubr.bf16.mxu0 %v5563_v2 }
 0x22e   : > { %4415 = vmatmul.mubr.msk.bf16.gmra.mrb[40].mxu0 %vm576_vm0, %v5843_v60 }
 0x22f   : > { %1789 = vmatprep.mubr.bf16.mxu0 %v5563_v2 }
 0x236   : > { %4416 = vmatmul.mubr.msk.bf16.gmra.mrb[44].mxu0 %vm576_vm0, %v5850_v63 }
 0x237   : > { %1799 = vmatprep.mubr.bf16.mxu0 %v5563_v2 }
 0x23e   : > { %4417 = vmatmul.mubr.msk.bf16.gmra.mrb[48].mxu0 %vm576_vm0, %v5968_v13 }
 0x23f   : > { %1809 = vmatprep.mubr.bf16.mxu0 %v5563_v2 }
 0x246   : > { %4418 = vmatmul.mubr.msk.bf16.gmra.mrb[52].mxu0 %vm576_vm0, %v1623_v20 }
 0x2b1   : > { %v1681_v29 = vpop.f32.mrb[0].mxu0 }
 0x2b2   : > { %v4857_v30 = vadd.f32 %v1681_v29, %v6078_v27  ;;  %v1683_v31 = vpop.f32.mrb[1].mxu0 }
 0x2b3   : > { %v4858_v32 = vadd.f32 %v1683_v31, %v6082_v28  ;;  %v1685_v33 = vpop.f32.mrb[2].mxu0 }
 0x2b4   : > { %v4859_v34 = vadd.f32 %v1685_v33, %v6078_v27  ;;  %v1687_v35 = vpop.f32.mrb[3].mxu0  ;;  %v1876_v37 = vmax.f32 %v4857_v30, 0.0 }
 0x2b5   : > { %v4860_v36 = vadd.f32 %v1687_v35, %v6082_v28  ;;  %v1877_v39 = vmax.f32 %v4858_v32, 0.0 }
 0x2b6   : > { %v1878_v38 = vmax.f32 %v4859_v34, 0.0 }
 0x2b7   : > { %v1879_v40 = vmax.f32 %v4860_v36, 0.0 }
 0x2b8   : > { %v1946_v41 = vpack.c.bf16 %v1878_v38, %v1876_v37 }
 0x2b9   : > { %v1691_v42 = vpop.f32.mrb[4].mxu0  ;;  %v1947_v43 = vpack.c.bf16 %v1879_v40, %v1877_v39 }
 0x2ba   : > { %v4861_v44 = vadd.f32 %v1691_v42, %v6078_v27  ;;  %v1693_v45 = vpop.f32.mrb[5].mxu0 }
 0x2bb   : > { %v4862_v46 = vadd.f32 %v1693_v45, %v6082_v28  ;;  %v1695_v47 = vpop.f32.mrb[6].mxu0  ;;  %2059 = vmatprep.subr.bf16.mxu1 %v1947_v43 }
 0x2bc   : > { %v4863_v48 = vadd.f32 %v1695_v47, %v6078_v27  ;;  %v1697_v49 = vpop.f32.mrb[7].mxu0  ;;  %2060 = vmatpush1.bf16.msra.mxu1 %v1946_v41  ;;  %v1880_v51 = vmax.f32 %v4861_v44, 0.0 }
 0x2bd   : > { %v4864_v50 = vadd.f32 %v1697_v49, %v6082_v28  ;;  %v1881_v53 = vmax.f32 %v4862_v46, 0.0 }
 0x2be   : > { %v1882_v52 = vmax.f32 %v4863_v48, 0.0 }
 0x2bf   : > { %v1883_v54 = vmax.f32 %v4864_v50, 0.0 }
 0x2c0   : > { %v1948_v55 = vpack.c.bf16 %v1882_v52, %v1880_v51 }
 0x2c1   : > { %v1949_v56 = vpack.c.bf16 %v1883_v54, %v1881_v53  ;;  %v1701_v57 = vpop.f32.mrb[8].mxu0 }
 0x2c2   : > { %v4865_v58 = vadd.f32 %v1701_v57, %v6078_v27  ;;  %v1703_v59 = vpop.f32.mrb[9].mxu0 }
 0x2c3   : > { %v4866_v60 = vadd.f32 %v1703_v59, %v6082_v28  ;;  %v1705_v61 = vpop.f32.mrb[10].mxu0  ;;  %2061 = vmatprep.subr.bf16.mxu1 %v1949_v56 }
 0x2c4   : > { %v4867_v62 = vadd.f32 %v1705_v61, %v6078_v27  ;;  %v1707_v63 = vpop.f32.mrb[11].mxu0  ;;  %2062 = vmatpush1.bf16.msra.mxu1 %v1948_v55  ;;  %v1884_v1 = vmax.f32 %v4865_v58, 0.0 }
 0x2c5   : > { %v4868_v0 = vadd.f32 %v1707_v63, %v6082_v28  ;;  %v1885_v4 = vmax.f32 %v4866_v60, 0.0 }
 0x2c6   : > { %v1886_v3 = vmax.f32 %v4867_v62, 0.0 }
 0x2c7   : > { %v1887_v5 = vmax.f32 %v4868_v0, 0.0 }
 0x2c8   : > { %v1950_v6 = vpack.c.bf16 %v1886_v3, %v1884_v1 }
 0x2c9   : > { %v1951_v7 = vpack.c.bf16 %v1887_v5, %v1885_v4  ;;  %v1711_v8 = vpop.f32.mrb[12].mxu0 }
 0x2ca   : > { %v4869_v9 = vadd.f32 %v1711_v8, %v6078_v27  ;;  %v1713_v10 = vpop.f32.mrb[13].mxu0 }
 0x2cb   : > { %v4870_v11 = vadd.f32 %v1713_v10, %v6082_v28  ;;  %v1715_v12 = vpop.f32.mrb[14].mxu0  ;;  %2063 = vmatprep.subr.bf16.mxu1 %v1951_v7 }
 0x2cc   : > { %v4871_v13 = vadd.f32 %v1715_v12, %v6078_v27  ;;  %v1717_v14 = vpop.f32.mrb[15].mxu0  ;;  %2064 = vmatpush1.bf16.msra.mxu1 %v1950_v6  ;;  %v1888_v16 = vmax.f32 %v4869_v9, 0.0 }
 0x2cd   : > { %v4872_v15 = vadd.f32 %v1717_v14, %v6082_v28  ;;  %v1889_v18 = vmax.f32 %v4870_v11, 0.0 }
 0x2ce   : > { %v1890_v17 = vmax.f32 %v4871_v13, 0.0 }
 0x2cf   : > { %v1891_v19 = vmax.f32 %v4872_v15, 0.0 }
 0x2d0   : > { %v1952_v20 = vpack.c.bf16 %v1890_v17, %v1888_v16 }
 0x2d1   : > { %v1953_v21 = vpack.c.bf16 %v1891_v19, %v1889_v18  ;;  %v1721_v22 = vpop.f32.mrb[16].mxu0 }
 0x2d2   : > { %v4873_v25 = vadd.f32 %v1721_v22, %v6078_v27  ;;  %v1723_v29 = vpop.f32.mrb[17].mxu0 }
 0x2d3   : > { %v4874_v30 = vadd.f32 %v1723_v29, %v6082_v28  ;;  %v1725_v31 = vpop.f32.mrb[18].mxu0  ;;  %2065 = vmatprep.subr.bf16.mxu1 %v1953_v21 }
 0x2d4   : > { %v4875_v32 = vadd.f32 %v1725_v31, %v6078_v27  ;;  %v1727_v33 = vpop.f32.mrb[19].mxu0  ;;  %2066 = vmatpush1.bf16.msra.mxu1 %v1952_v20  ;;  %v1892_v35 = vmax.f32 %v4873_v25, 0.0 }
 0x2d5   : > { %v4876_v34 = vadd.f32 %v1727_v33, %v6082_v28  ;;  %v1893_v37 = vmax.f32 %v4874_v30, 0.0 }
 0x2d6   : > { %v1894_v36 = vmax.f32 %v4875_v32, 0.0 }
 0x2d7   : > { %v1895_v38 = vmax.f32 %v4876_v34, 0.0 }
 0x2d8   : > { %v1954_v39 = vpack.c.bf16 %v1894_v36, %v1892_v35 }
 0x2d9   : > { %v1955_v40 = vpack.c.bf16 %v1895_v38, %v1893_v37  ;;  %v1731_v41 = vpop.f32.mrb[20].mxu0 }
 0x2da   : > { %v4877_v42 = vadd.f32 %v1731_v41, %v6078_v27  ;;  %v1733_v43 = vpop.f32.mrb[21].mxu0 }
 0x2db   : > { %v4878_v44 = vadd.f32 %v1733_v43, %v6082_v28  ;;  %v1735_v45 = vpop.f32.mrb[22].mxu0  ;;  %2067 = vmatprep.subr.bf16.mxu1 %v1955_v40 }
 0x2dc   : > { %v4879_v46 = vadd.f32 %v1735_v45, %v6078_v27  ;;  %v1737_v47 = vpop.f32.mrb[23].mxu0  ;;  %2068 = vmatpush1.bf16.msra.mxu1 %v1954_v39  ;;  %v1896_v49 = vmax.f32 %v4877_v42, 0.0 }
 0x2dd   : > { %v4880_v48 = vadd.f32 %v1737_v47, %v6082_v28  ;;  %v1897_v51 = vmax.f32 %v4878_v44, 0.0 }
 0x2de   : > { %v1898_v50 = vmax.f32 %v4879_v46, 0.0 }
 0x2df   : > { %v1899_v52 = vmax.f32 %v4880_v48, 0.0 }
 0x2e0   : > { %v1956_v53 = vpack.c.bf16 %v1898_v50, %v1896_v49 }
 0x2e1   : > { %v1957_v54 = vpack.c.bf16 %v1899_v52, %v1897_v51  ;;  %v1741_v55 = vpop.f32.mrb[24].mxu0 }
 0x2e2   : > { %v4881_v56 = vadd.f32 %v1741_v55, %v6078_v27  ;;  %v1743_v57 = vpop.f32.mrb[25].mxu0 }
 0x2e3   : > { %v4882_v58 = vadd.f32 %v1743_v57, %v6082_v28  ;;  %v1745_v59 = vpop.f32.mrb[26].mxu0  ;;  %2069 = vmatprep.subr.bf16.mxu1 %v1957_v54 }
 0x2e4   : > { %v4883_v60 = vadd.f32 %v1745_v59, %v6078_v27  ;;  %v1747_v61 = vpop.f32.mrb[27].mxu0  ;;  %2070 = vmatpush1.bf16.msra.mxu1 %v1956_v53  ;;  %v1900_v63 = vmax.f32 %v4881_v56, 0.0 }
 0x2e5   : > { %v4884_v62 = vadd.f32 %v1747_v61, %v6082_v28  ;;  %v1901_v1 = vmax.f32 %v4882_v58, 0.0 }
 0x2e6   : > { %v1902_v0 = vmax.f32 %v4883_v60, 0.0 }
 0x2e7   : > { %v1903_v3 = vmax.f32 %v4884_v62, 0.0 }
 0x2e8   : > { %v1958_v4 = vpack.c.bf16 %v1902_v0, %v1900_v63 }
 0x2e9   : > { %v1959_v5 = vpack.c.bf16 %v1903_v3, %v1901_v1  ;;  %v1751_v6 = vpop.f32.mrb[28].mxu0 }
 0x2ea   : > { %v4885_v7 = vadd.f32 %v1751_v6, %v6078_v27  ;;  %v1753_v8 = vpop.f32.mrb[29].mxu0 }
 0x2eb   : > { %v4886_v9 = vadd.f32 %v1753_v8, %v6082_v28  ;;  %v1755_v10 = vpop.f32.mrb[30].mxu0  ;;  %2071 = vmatprep.subr.bf16.mxu1 %v1959_v5 }
 0x2ec   : > { %v4887_v11 = vadd.f32 %v1755_v10, %v6078_v27  ;;  %v1757_v12 = vpop.f32.mrb[31].mxu0  ;;  %2072 = vmatpush1.bf16.msra.mxu1 %v1958_v4  ;;  %v1904_v14 = vmax.f32 %v4885_v7, 0.0 }
 0x2ed   : > { %v4888_v13 = vadd.f32 %v1757_v12, %v6082_v28  ;;  %v1905_v16 = vmax.f32 %v4886_v9, 0.0 }
 0x2ee   : > { %v1906_v15 = vmax.f32 %v4887_v11, 0.0 }
 0x2ef   : > { %v1907_v17 = vmax.f32 %v4888_v13, 0.0 }
 0x2f0   : > { %v1960_v18 = vpack.c.bf16 %v1906_v15, %v1904_v14 }
 0x2f1   : > { %v1961_v19 = vpack.c.bf16 %v1907_v17, %v1905_v16  ;;  %v1761_v20 = vpop.f32.mrb[32].mxu0 }
 0x2f2   : > { %v4889_v21 = vadd.f32 %v1761_v20, %v6078_v27  ;;  %v1763_v22 = vpop.f32.mrb[33].mxu0 }
 0x2f3   : > { %v4890_v25 = vadd.f32 %v1763_v22, %v6082_v28  ;;  %v1765_v29 = vpop.f32.mrb[34].mxu0  ;;  %2073 = vmatprep.subr.bf16.mxu1 %v1961_v19 }
 0x2f4   : > { %v4891_v30 = vadd.f32 %v1765_v29, %v6078_v27  ;;  %v1767_v31 = vpop.f32.mrb[35].mxu0  ;;  %2074 = vmatpush1.bf16.msra.mxu1 %v1960_v18  ;;  %v1908_v33 = vmax.f32 %v4889_v21, 0.0 }
 0x2f5   : > { %v4892_v32 = vadd.f32 %v1767_v31, %v6082_v28  ;;  %v1909_v35 = vmax.f32 %v4890_v25, 0.0 }
 0x2f6   : > { %v1910_v34 = vmax.f32 %v4891_v30, 0.0 }
 0x2f7   : > { %v1911_v36 = vmax.f32 %v4892_v32, 0.0 }
 0x2f8   : > { %v1962_v37 = vpack.c.bf16 %v1910_v34, %v1908_v33 }
 0x2f9   : > { %v1963_v38 = vpack.c.bf16 %v1911_v36, %v1909_v35  ;;  %v1771_v39 = vpop.f32.mrb[36].mxu0 }
 0x2fa   : > { %v4893_v40 = vadd.f32 %v1771_v39, %v6078_v27  ;;  %v1773_v41 = vpop.f32.mrb[37].mxu0 }
 0x2fb   : > { %v4894_v42 = vadd.f32 %v1773_v41, %v6082_v28  ;;  %v1775_v43 = vpop.f32.mrb[38].mxu0  ;;  %2075 = vmatprep.subr.bf16.mxu1 %v1963_v38 }
 0x2fc   : > { %v4895_v44 = vadd.f32 %v1775_v43, %v6078_v27  ;;  %v1777_v45 = vpop.f32.mrb[39].mxu0  ;;  %2076 = vmatpush1.bf16.msra.mxu1 %v1962_v37  ;;  %v1912_v47 = vmax.f32 %v4893_v40, 0.0 }
 0x2fd   : > { %v4896_v46 = vadd.f32 %v1777_v45, %v6082_v28  ;;  %v1913_v49 = vmax.f32 %v4894_v42, 0.0 }
 0x2fe   : > { %v1914_v48 = vmax.f32 %v4895_v44, 0.0 }
 0x2ff   : > { %v1915_v50 = vmax.f32 %v4896_v46, 0.0 }
 0x300   : > { %v1964_v51 = vpack.c.bf16 %v1914_v48, %v1912_v47 }
 0x301   : > { %v1965_v52 = vpack.c.bf16 %v1915_v50, %v1913_v49  ;;  %v1781_v53 = vpop.f32.mrb[40].mxu0 }
 0x302   : > { %v4897_v54 = vadd.f32 %v1781_v53, %v6078_v27  ;;  %v1783_v55 = vpop.f32.mrb[41].mxu0  ;;  %v5331_v53 = vld [vmem:[%s6853_s3 + $0x10] ss:$8 sps:$4 sm:$0xff]  }
 0x303   : > { %v4898_v56 = vadd.f32 %v1783_v55, %v6082_v28  ;;  %v1785_v57 = vpop.f32.mrb[42].mxu0  ;;  %2077 = vmatprep.subr.bf16.mxu1 %v1965_v52  ;;  %v5348_v52 = vld [vmem:[%s6854_s4 + $0x8] sm:$0xff]   ;;  %v5349_v55 = vld [vmem:[%s6854_s4 + $0x10] sm:$0xff]  }
 0x304   : > { %v4899_v58 = vadd.f32 %v1785_v57, %v6078_v27  ;;  %v1787_v59 = vpop.f32.mrb[43].mxu0  ;;  %2078 = vmatpush1.bf16.msra.mxu1 %v1964_v51  ;;  %v1916_v61 = vmax.f32 %v4897_v54, 0.0  ;;  %v5326_v51 = vld [vmem:[%s6853_s3] ss:$8 sps:$4 sm:$0xff]   ;;  %v5332_v54 = vld [vmem:[%s6853_s3 + $0x24] ss:$8 sps:$4 sm:$0xff]  }
 0x305   : > { %v4900_v60 = vadd.f32 %v1787_v59, %v6082_v28  ;;  %v1917_v63 = vmax.f32 %v4898_v56, 0.0  ;;  %v5350_v56 = vld [vmem:[%s6854_s4 + $0x18] sm:$0xff]   ;;  %v5334_v57 = vld [vmem:[%s6853_s3 + $0x20] ss:$8 sps:$4 sm:$0xff]  }
 0x306   : > { %v1918_v62 = vmax.f32 %v4899_v58, 0.0  ;;  %v5335_v58 = vld [vmem:[%s6853_s3 + $0x34] ss:$8 sps:$4 sm:$0xff]   ;;  %v5351_v59 = vld [vmem:[%s6854_s4 + $0x20] sm:$0xff]  }
 0x307   : > { %v1919_v0 = vmax.f32 %v4900_v60, 0.0  ;;  %v5352_v60 = vld [vmem:[%s6854_s4 + $0x28] sm:$0xff]  }
 0x308   : > { %v1966_v1 = vpack.c.bf16 %v1918_v62, %v1916_v61  ;;  %v5337_v61 = vld [vmem:[%s6853_s3 + $0x30] ss:$8 sps:$4 sm:$0xff]   ;;  %v5338_v62 = vld [vmem:[%s6853_s3 + $0x44] ss:$8 sps:$4 sm:$0xff]  }
 0x309   : > { %v1967_v3 = vpack.c.bf16 %v1919_v0, %v1917_v63  ;;  %v1791_v4 = vpop.f32.mrb[44].mxu0  ;;  %v5353_v63 = vld [vmem:[%s6854_s4 + $0x30] sm:$0xff]   ;;  %v5354_v0 = vld [vmem:[%s6854_s4 + $0x38] sm:$0xff]  }
 0x30a   : > { %v4901_v5 = vadd.f32 %v1791_v4, %v6078_v27  ;;  %v1793_v6 = vpop.f32.mrb[45].mxu0  ;;  %v5355_v4 = vld [vmem:[%s6854_s4 + $0x40] sm:$0xff]  }
 0x30b   : > { %v4902_v7 = vadd.f32 %v1793_v6, %v6082_v28  ;;  %v1795_v8 = vpop.f32.mrb[46].mxu0  ;;  %2079 = vmatprep.subr.bf16.mxu1 %v1967_v3  ;;  %v5341_v3 = vld [vmem:[%s6853_s3 + $0x54] ss:$8 sps:$4 sm:$0xff]   ;;  %v5344_v6 = vld [vmem:[%s6853_s3 + $0x64] ss:$8 sps:$4 sm:$0xff]  }
 0x30c   : > { %v4903_v9 = vadd.f32 %v1795_v8, %v6078_v27  ;;  %v1797_v10 = vpop.f32.mrb[47].mxu0  ;;  %2080 = vmatpush1.bf16.msra.mxu1 %v1966_v1  ;;  %v1920_v12 = vmax.f32 %v4901_v5, 0.0  ;;  %v5340_v1 = vld [vmem:[%s6853_s3 + $0x40] ss:$8 sps:$4 sm:$0xff]   ;;  %v5343_v5 = vld [vmem:[%s6853_s3 + $0x50] ss:$8 sps:$4 sm:$0xff]  }
 0x30d   : > { %v4904_v11 = vadd.f32 %v1797_v10, %v6082_v28  ;;  %v1921_v14 = vmax.f32 %v4902_v7, 0.0  ;;  %v5346_v7 = vld [vmem:[%s6853_s3 + $0x60] ss:$8 sps:$4 sm:$0xff]  }
 0x30e   : > { %v1922_v13 = vmax.f32 %v4903_v9, 0.0  ;;  %v5356_v8 = vld [vmem:[%s6854_s4 + $0x48] sm:$0xff]   ;;  %v5357_v9 = vld [vmem:[%s6854_s4 + $0x50] ss:$0 sps:$4 sm:$0xff]  }
 0x30f   : > { %v1923_v15 = vmax.f32 %v4904_v11, 0.0  ;;  %v2284_v10 = vsel %vm2282_vm2, %v5357_v9, 0  ;;  %v5360_v11 = vld [vmem:[%s6855_s5 + $0x4] ss:$8 sps:$4 sm:$0xff]  }
 0x310   : > { %v1968_v16 = vpack.c.bf16 %v1922_v13, %v1920_v12 }
 0x311   : > { %v1969_v17 = vpack.c.bf16 %v1923_v15, %v1921_v14  ;;  %v1801_v18 = vpop.f32.mrb[48].mxu0 }
 0x312   : > { %v4905_v19 = vadd.f32 %v1801_v18, %v6078_v27  ;;  %v1803_v20 = vpop.f32.mrb[49].mxu0  ;;  %v5358_v18 = vld [vmem:[%s6855_s5] ss:$8 sps:$4 sm:$0xff]  }
 0x313   : > { %v4906_v21 = vadd.f32 %v1803_v20, %v6082_v28  ;;  %v1805_v22 = vpop.f32.mrb[50].mxu0  ;;  %2081 = vmatprep.subr.bf16.mxu1 %v1969_v17 }
 0x314   : > { %v4907_v25 = vadd.f32 %v1805_v22, %v6078_v27  ;;  %v1807_v29 = vpop.f32.mrb[51].mxu0  ;;  %2082 = vmatpush1.bf16.msra.mxu1 %v1968_v16  ;;  %v1924_v31 = vmax.f32 %v4905_v19, 0.0  ;;  %v5363_v19 = vld [vmem:[%s6855_s5 + $0x14] ss:$8 sps:$4 sm:$0xff]  }
 0x315   : > { %v4908_v30 = vadd.f32 %v1807_v29, %v6082_v28  ;;  %v1925_v33 = vmax.f32 %v4906_v21, 0.0  ;;  %v5361_v21 = vld [vmem:[%s6855_s5 + $0x10] ss:$8 sps:$4 sm:$0xff]  }
 0x316   : > { %v1926_v32 = vmax.f32 %v4907_v25, 0.0  ;;  %v5366_v25 = vld [vmem:[%s6855_s5 + $0x24] ss:$8 sps:$4 sm:$0xff]  }
 0x317   : > { %v1927_v34 = vmax.f32 %v4908_v30, 0.0 }
 0x318   : > { %v1970_v35 = vpack.c.bf16 %v1926_v32, %v1924_v31 }
 0x319   : > { %v1971_v36 = vpack.c.bf16 %v1927_v34, %v1925_v33  ;;  %v1811_v37 = vpop.f32.mrb[52].mxu0  ;;  %v5364_v33 = vld [vmem:[%s6855_s5 + $0x20] ss:$8 sps:$4 sm:$0xff]   ;;  %v5369_v34 = vld [vmem:[%s6855_s5 + $0x34] ss:$8 sps:$4 sm:$0xff]  }
 0x31a   : > { %v4909_v38 = vadd.f32 %v1811_v37, %v6078_v27  ;;  %v1813_v39 = vpop.f32.mrb[53].mxu0 }
 0x31b   : > { %v4910_v40 = vadd.f32 %v1813_v39, %v6082_v28  ;;  %v1815_v41 = vpop.f32.mrb[54].mxu0  ;;  %2083 = vmatprep.subr.bf16.mxu1 %v1971_v36  ;;  %v5367_v36 = vld [vmem:[%s6855_s5 + $0x30] ss:$8 sps:$4 sm:$0xff]  }
 0x31c   : > { %v4911_v42 = vadd.f32 %v1815_v41, %v6078_v27  ;;  %v1817_v43 = vpop.f32.mrb[55].mxu0  ;;  %2084 = vmatpush1.bf16.msra.mxu1 %v1970_v35  ;;  %v1928_v45 = vmax.f32 %v4909_v38, 0.0  ;;  %v5329_v27 = vld [vmem:[%s6853_s3 + $0x14] ss:$8 sps:$4 sm:$0xff]   ;;  %v5372_v38 = vld [vmem:[%s6855_s5 + $0x44] ss:$8 sps:$4 sm:$0xff]  }
 0x31d   : > { %v4912_v44 = vadd.f32 %v1817_v43, %v6082_v28  ;;  %v1929_v47 = vmax.f32 %v4910_v40, 0.0  ;;  %v5347_v28 = vld [vmem:[%s6854_s4] sm:$0xff]  }
 0x31e   : > { %v1930_v46 = vmax.f32 %v4911_v42, 0.0  ;;  %v5370_v43 = vld [vmem:[%s6855_s5 + $0x40] ss:$8 sps:$4 sm:$0xff]  }
 0x31f   : > { %v1931_v48 = vmax.f32 %v4912_v44, 0.0 }
 0x320   : > { %v1972_v49 = vpack.c.bf16 %v1930_v46, %v1928_v45 }
 0x321   : > { %v1973_v50 = vpack.c.bf16 %v1931_v48, %v1929_v47 }
 0x323   : > { %2085 = vmatprep.subr.bf16.mxu1 %v1973_v50 }
 0x324   : > { %2086 = vmatpush1.bf16.msra.mxu1 %v1972_v49 }
 0x325   : > { %2286 = vmatprep.subr.bf16.mxu1 %v5563_v2 }
 0x327   : > { %2092 = vmatmul.mubr.bf16.vlgmr.msra.gmra.mrb[0].mxu1 %v5326_v51 }
 0x328   : > { %4434 = vmatprep.mubr.msk.bf16.mxu1 %vm2037_vm1, %v5329_v27  ;;  %2287 = vmatpush1.bf16.msra.mxu1 %v5347_v28 }
 0x329   : > { %2288 = vmatprep.subr.bf16.mxu1 %v5563_v2 }
 0x32c   : > { %2289 = vmatpush1.bf16.msra.mxu1 %v5348_v52 }
 0x32d   : > { %2290 = vmatprep.subr.bf16.mxu1 %v5563_v2 }
 0x32f   : > { %2102 = vmatmul.mubr.bf16.gmra.mrb[4].mxu1 %v5331_v53 }
 0x330   : > { %4435 = vmatprep.mubr.msk.bf16.mxu1 %vm2037_vm1, %v5332_v54  ;;  %2291 = vmatpush1.bf16.msra.mxu1 %v5349_v55 }
 0x331   : > { %2292 = vmatprep.subr.bf16.mxu1 %v5563_v2 }
 0x334   : > { %2293 = vmatpush1.bf16.msra.mxu1 %v5350_v56 }
 0x335   : > { %2294 = vmatprep.subr.bf16.mxu1 %v5563_v2 }
 0x337   : > { %2112 = vmatmul.mubr.bf16.gmra.mrb[8].mxu1 %v5334_v57 }
 0x338   : > { %4436 = vmatprep.mubr.msk.bf16.mxu1 %vm2037_vm1, %v5335_v58  ;;  %2295 = vmatpush1.bf16.msra.mxu1 %v5351_v59 }
 0x339   : > { %2296 = vmatprep.subr.bf16.mxu1 %v5563_v2 }
 0x33c   : > { %2297 = vmatpush1.bf16.msra.mxu1 %v5352_v60 }
 0x33d   : > { %2298 = vmatprep.subr.bf16.mxu1 %v5563_v2 }
 0x33f   : > { %2122 = vmatmul.mubr.bf16.gmra.mrb[12].mxu1 %v5337_v61 }
 0x340   : > { %4437 = vmatprep.mubr.msk.bf16.mxu1 %vm2037_vm1, %v5338_v62  ;;  %2299 = vmatpush1.bf16.msra.mxu1 %v5353_v63 }
 0x341   : > { %2300 = vmatprep.subr.bf16.mxu1 %v5563_v2 }
 0x344   : > { %2301 = vmatpush1.bf16.msra.mxu1 %v5354_v0 }
 0x345   : > { %2302 = vmatprep.subr.bf16.mxu1 %v5563_v2 }
 0x347   : > { %2132 = vmatmul.mubr.bf16.gmra.mrb[16].mxu1 %v5340_v1 }
 0x348   : > { %4438 = vmatprep.mubr.msk.bf16.mxu1 %vm2037_vm1, %v5341_v3  ;;  %2303 = vmatpush1.bf16.msra.mxu1 %v5355_v4  ;;  %v2385_v3 = vld [vmem:[%s6855_s5 + $0x50] sm:$0x33] }
 0x349   : > { %2304 = vmatprep.subr.bf16.mxu1 %v5563_v2  ;;  %v4469_v4 = vcombine.high %v2385_v3, %v2385_v3 }
 0x34c   : > { %2305 = vmatpush1.bf16.msra.mxu1 %v5356_v8 }
 0x34d   : > { %2306 = vmatprep.subr.bf16.mxu1 %v5563_v2 }
 0x34f   : > { %2142 = vmatmul.mubr.bf16.gmra.mrb[20].mxu1 %v5343_v5  ;;  %v4468_v5 = vcombine.low %v2385_v3, %v2385_v3 }
 0x350   : > { %4439 = vmatprep.mubr.msk.bf16.mxu1 %vm2037_vm1, %v5344_v6  ;;  %2307 = vmatpush1.bf16.msra.mxu1 %v2284_v10 }
 0x351   : > { %2481 = vmatprep.subr.bf16.mxu1 %v5360_v11  ;;  %v2476_v6 = vsel %vm2474_vm4, %v4468_v5, 0  ;;  %v5375_v11 = vld [vmem:[%s6855_s5 + $0x58] ss:$8 sps:$4 sm:$0xff]  }
 0x357   : > { %2152 = vmatmul.mubr.bf16.gmra.mrb[24].mxu1 %v5346_v7  ;;  %v5377_v7 = vld [vmem:[%s6855_s5 + $0x5c] ss:$8 sps:$4 sm:$0xff]  }
 0x3fa   : > { %v2093_v12 = vpop.f32.mrb[0].mxu1 }
 0x3fb   : > { %v2095_v13 = vpop.f32.mrb[1].mxu1 }
 0x3fc   : > { %v2097_v14 = vpop.f32.mrb[2].mxu1 }
 0x3fd   : > { %v2183_v15 = vpack.c.bf16 %v2097_v14, %v2093_v12  ;;  %v2099_v16 = vpop.f32.mrb[3].mxu1  ;;  %v5380_v14 = vld [vmem:[%s6855_s5 + $0x6c] ss:$8 sps:$4 sm:$0xff]  }
 0x3fe   : > { %v2184_v17 = vpack.c.bf16 %v2099_v16, %v2095_v13  ;;  %v5383_v16 = vld [vmem:[%s6855_s5 + $0x7c] ss:$8 sps:$4 sm:$0xff]  }
 0x400   : > { %4451 = vmatprep.mubr.msk.bf16.mxu1 %vm2260_vm3, %v2184_v17 }
 0x401   : > { %2319 = vmatmul.mubr.bf16.vlgmr.msra.gmra.mrb[28].mxu1 %v2183_v15  ;;  %v5378_v15 = vld [vmem:[%s6855_s5 + $0x68] ss:$8 sps:$4 sm:$0xff]  }
 0x402   : > { %v2103_v20 = vpop.f32.mrb[4].mxu1  ;;  %2482 = vmatpush1.bf16.msra.mxu1 %v5358_v18 }
 0x403   : > { %v2105_v22 = vpop.f32.mrb[5].mxu1  ;;  %2483 = vmatprep.subr.bf16.mxu1 %v5363_v19 }
 0x404   : > { %v2107_v29 = vpop.f32.mrb[6].mxu1 }
 0x405   : > { %v2185_v30 = vpack.c.bf16 %v2107_v29, %v2103_v20  ;;  %v2109_v31 = vpop.f32.mrb[7].mxu1  ;;  %v5386_v29 = vld [vmem:[%s6855_s5 + $0x8c] ss:$8 sps:$4 sm:$0xff]  }
 0x406   : > { %v2186_v32 = vpack.c.bf16 %v2109_v31, %v2105_v22  ;;  %2484 = vmatpush1.bf16.msra.mxu1 %v5361_v21  ;;  %v5381_v21 = vld [vmem:[%s6855_s5 + $0x78] ss:$8 sps:$4 sm:$0xff]   ;;  %v5389_v31 = vld [vmem:[%s6855_s5 + $0x9c] ss:$8 sps:$4 sm:$0xff]  }
 0x407   : > { %2485 = vmatprep.subr.bf16.mxu1 %v5366_v25 }
 0x408   : > { %4452 = vmatprep.mubr.msk.bf16.mxu1 %vm2260_vm3, %v2186_v32 }
 0x409   : > { %2327 = vmatmul.mubr.bf16.gmra.mrb[32].mxu1 %v2185_v30  ;;  %v5384_v30 = vld [vmem:[%s6855_s5 + $0x88] ss:$8 sps:$4 sm:$0xff]  }
 0x40a   : > { %v2113_v35 = vpop.f32.mrb[8].mxu1  ;;  %2486 = vmatpush1.bf16.msra.mxu1 %v5364_v33  ;;  %v4486_v33 = vld [vmem:[%s6855_s5 + $0xa8] sm:$0x33] }
 0x40b   : > { %v2115_v37 = vpop.f32.mrb[9].mxu1  ;;  %2487 = vmatprep.subr.bf16.mxu1 %v5369_v34 }
 0x40c   : > { %v2117_v39 = vpop.f32.mrb[10].mxu1 }
 0x40d   : > { %v2187_v40 = vpack.c.bf16 %v2117_v39, %v2113_v35  ;;  %v2119_v41 = vpop.f32.mrb[11].mxu1 }
 0x40e   : > { %v2188_v42 = vpack.c.bf16 %v2119_v41, %v2115_v37  ;;  %2488 = vmatpush1.bf16.msra.mxu1 %v5367_v36  ;;  %v5387_v37 = vld [vmem:[%s6855_s5 + $0x98] ss:$8 sps:$4 sm:$0xff]   ;;  %v4497_v41 = vcombine.low %v4486_v33, %v4486_v33 }
 0x40f   : > { %2489 = vmatprep.subr.bf16.mxu1 %v5372_v38 }
 0x410   : > { %4453 = vmatprep.mubr.msk.bf16.mxu1 %vm2260_vm3, %v2188_v42  ;;  %v2652_v42 = vsel %vm2474_vm4, %v4497_v41, 0  ;;  %v5434_v41 = vld [vmem:[%s6855_s5 + $0x184] ss:$8 sps:$4 sm:$0xff]  }
 0x411   : > { %2335 = vmatmul.mubr.bf16.gmra.mrb[36].mxu1 %v2187_v40  ;;  %v4498_v40 = vcombine.high %v4486_v33, %v4486_v33 }
 0x412   : > { %v2123_v44 = vpop.f32.mrb[12].mxu1  ;;  %2490 = vmatpush1.bf16.msra.mxu1 %v5370_v43  ;;  %v5394_v43 = vld [vmem:[%s6855_s5 + $0xb4] ss:$8 sps:$4 sm:$0xff]  }
 0x413   : > { %v2125_v45 = vpop.f32.mrb[13].mxu1  ;;  %4470 = vmatprep.subr.msk.bf16.mxu1 %vm2474_vm4, %v4469_v4  ;;  %v5398_v4 = vld [vmem:[%s6855_s5 + $0xd0] ss:$8 sps:$4 sm:$0xff]  }
 0x414   : > { %v2127_v46 = vpop.f32.mrb[14].mxu1 }
 0x415   : > { %v2189_v47 = vpack.c.bf16 %v2127_v46, %v2123_v44  ;;  %v2129_v48 = vpop.f32.mrb[15].mxu1 }
 0x416   : > { %v2190_v49 = vpack.c.bf16 %v2129_v48, %v2125_v45  ;;  %2492 = vmatpush1.bf16.msra.mxu1 %v2476_v6  ;;  %v5403_v6 = vld [vmem:[%s6855_s5 + $0xe4] ss:$8 sps:$4 sm:$0xff]  }
 0x417   : > { %2657 = vmatprep.subr.bf16.mxu1 %v5377_v7 }
 0x418   : > { %4454 = vmatprep.mubr.msk.bf16.mxu1 %vm2260_vm3, %v2190_v49 }
 0x419   : > { %2343 = vmatmul.mubr.bf16.gmra.mrb[40].mxu1 %v2189_v47 }
 0x41a   : > { %v2133_v50 = vpop.f32.mrb[16].mxu1 }
 0x41b   : > { %v2135_v51 = vpop.f32.mrb[17].mxu1 }
 0x41c   : > { %v2137_v27 = vpop.f32.mrb[18].mxu1 }
 0x41d   : > { %v2191_v28 = vpack.c.bf16 %v2137_v27, %v2133_v50  ;;  %v2139_v52 = vpop.f32.mrb[19].mxu1 }
 0x41e   : > { %v2192_v53 = vpack.c.bf16 %v2139_v52, %v2135_v51 }
 0x420   : > { %4455 = vmatprep.mubr.msk.bf16.mxu1 %vm2260_vm3, %v2192_v53 }
 0x421   : > { %2351 = vmatmul.mubr.bf16.gmra.mrb[44].mxu1 %v2191_v28 }
 0x422   : > { %v2143_v54 = vpop.f32.mrb[20].mxu1 }
 0x423   : > { %v2145_v55 = vpop.f32.mrb[21].mxu1 }
 0x424   : > { %v2147_v56 = vpop.f32.mrb[22].mxu1 }
 0x425   : > { %v2193_v57 = vpack.c.bf16 %v2147_v56, %v2143_v54  ;;  %v2149_v58 = vpop.f32.mrb[23].mxu1 }
 0x426   : > { %v2194_v59 = vpack.c.bf16 %v2149_v58, %v2145_v55 }
 0x428   : > { %4456 = vmatprep.mubr.msk.bf16.mxu1 %vm2260_vm3, %v2194_v59  ;;  %v5397_v59 = vld [vmem:[%s6855_s5 + $0xc4] ss:$8 sps:$4 sm:$0xff]  }
 0x429   : > { %2359 = vmatmul.mubr.bf16.gmra.mrb[48].mxu1 %v2193_v57  ;;  %v5392_v57 = vld [vmem:[%s6855_s5 + $0xb0] ss:$8 sps:$4 sm:$0xff]  }
 0x42a   : > { %v2153_v60 = vpop.f32.mrb[24].mxu1 }
 0x42b   : > { %v2155_v61 = vpop.f32.mrb[25].mxu1 }
 0x42c   : > { %v2157_v62 = vpop.f32.mrb[26].mxu1 }
 0x42d   : > { %v2195_v63 = vpack.c.bf16 %v2157_v62, %v2153_v60  ;;  %v2159_v0 = vpop.f32.mrb[27].mxu1  ;;  %v5395_v62 = vld [vmem:[%s6855_s5 + $0xc0] ss:$8 sps:$4 sm:$0xff]  }
 0x42e   : > { %v2196_v1 = vpack.c.bf16 %v2159_v0, %v2155_v61 }
 0x430   : > { %4457 = vmatprep.mubr.msk.bf16.mxu1 %vm2260_vm3, %v2196_v1 }
 0x431   : > { %2367 = vmatmul.mubr.bf16.gmra.mrb[52].mxu1 %v2195_v63  ;;  %v5400_v63 = vld [vmem:[%s6855_s5 + $0xd4] ss:$8 sps:$4 sm:$0xff]  }
 0x432   : > { %2513 = vmatprep.mubr.bf16.mxu1 %v5563_v2 }
 0x4d4   : > { %v2320_v8 = vpop.f32.mrb[28].mxu1 }
 0x4d5   : > { %v2322_v9 = vpop.f32.mrb[29].mxu1 }
 0x4d6   : > { %v6276_v10 = vpop.f32.mrb[30].mxu1  ;;  %v5401_v9 = vld [vmem:[%s6855_s5 + $0xe0] ss:$8 sps:$4 sm:$0xff]  }
 0x4d7   : > { %v2386_v12 = vpack.c.bf16 %v6276_v10, %v2320_v8  ;;  %v2325_v13 = vpop.f32.mrb[31].mxu1 }
 0x4d9   : > { %4471 = vmatmul.mubr.msk.bf16.vlgmr.msra.gmra.mrb[56].mxu1 %vm2458_vm5, %v2386_v12  ;;  %v5404_v12 = vld [vmem:[%s6855_s5 + $0xf0] ss:$8 sps:$4 sm:$0xff]  }
 0x4da   : > { %2658 = vmatpush1.bf16.msra.mxu1 %v5375_v11  ;;  %2523 = vmatprep.mubr.bf16.mxu1 %v5563_v2  ;;  %v4515_v11 = vld [vmem:[%s6855_s5 + $0x100] sm:$0x33] }
 0x4db   : > { %2659 = vmatprep.subr.bf16.mxu1 %v5380_v14  ;;  %v4527_v13 = vcombine.high %v4515_v11, %v4515_v11  ;;  %v4526_v14 = vcombine.low %v4515_v11, %v4515_v11 }
 0x4dc   : > { %v2328_v17 = vpop.f32.mrb[32].mxu1 }
 0x4dd   : > { %v2576_v18 = vpack.c.bf16 %v2328_v17, %v6276_v10  ;;  %v2330_v19 = vpop.f32.mrb[33].mxu1  ;;  %v5406_v10 = vld [vmem:[%s6855_s5 + $0xf4] ss:$8 sps:$4 sm:$0xff]  }
 0x4de   : > { %v2331_v20 = vpop.f32.mrb[34].mxu1  ;;  %2660 = vmatpush1.bf16.msra.mxu1 %v5378_v15  ;;  %v2832_v15 = vsel %vm2474_vm4, %v4526_v14, 0  ;;  %v5412_v19 = vld [vmem:[%s6855_s5 + $0x118] ss:$8 sps:$4 sm:$0xff]  }
 0x4df   : > { %v6297_v22 = vpack.c.bf16 %v2331_v20, %v2328_v17  ;;  %v2333_v25 = vpop.f32.mrb[35].mxu1  ;;  %2661 = vmatprep.subr.bf16.mxu1 %v5383_v16  ;;  %v5411_v16 = vld [vmem:[%s6855_s5 + $0x10c] ss:$8 sps:$4 sm:$0xff]   ;;  %v5409_v17 = vld [vmem:[%s6855_s5 + $0x108] ss:$8 sps:$4 sm:$0xff]  }
 0x4e0   : > { %v5418_v25 = vld [vmem:[%s6855_s5 + $0x138] ss:$8 sps:$4 sm:$0xff]  }
 0x4e1   : > { %4472 = vmatmul.mubr.msk.bf16.gmra.mrb[60].mxu1 %vm2458_vm5, %v6297_v22 }
 0x4e2   : > { %2533 = vmatprep.mubr.bf16.mxu1 %v5563_v2  ;;  %2662 = vmatpush1.bf16.msra.mxu1 %v5381_v21  ;;  %v5415_v21 = vld [vmem:[%s6855_s5 + $0x128] ss:$8 sps:$4 sm:$0xff]  }
 0x4e3   : > { %2663 = vmatprep.subr.bf16.mxu1 %v5386_v29  ;;  %v5423_v29 = vld [vmem:[%s6855_s5 + $0x14c] ss:$8 sps:$4 sm:$0xff]  }
 0x4e4   : > { %v2336_v32 = vpop.f32.mrb[36].mxu1 }
 0x4e5   : > { %v6314_v34 = vpack.c.bf16 %v2336_v32, %v2331_v20  ;;  %v2338_v35 = vpop.f32.mrb[37].mxu1  ;;  %v5417_v20 = vld [vmem:[%s6855_s5 + $0x12c] ss:$8 sps:$4 sm:$0xff]  }
 0x4e6   : > { %v2339_v36 = vpop.f32.mrb[38].mxu1  ;;  %2664 = vmatpush1.bf16.msra.mxu1 %v5384_v30  ;;  %v4544_v30 = vld [vmem:[%s6855_s5 + $0x158] sm:$0x33] }
 0x4e7   : > { %v6319_v38 = vpack.c.bf16 %v2339_v36, %v2336_v32  ;;  %v2341_v39 = vpop.f32.mrb[39].mxu1  ;;  %2665 = vmatprep.subr.bf16.mxu1 %v5389_v31  ;;  %v5421_v31 = vld [vmem:[%s6855_s5 + $0x148] ss:$8 sps:$4 sm:$0xff]   ;;  %v4556_v32 = vcombine.high %v4544_v30, %v4544_v30  ;;  %v4555_v33 = vcombine.low %v4544_v30, %v4544_v30 }
 0x4e8   : > { %v5431_v39 = vld [vmem:[%s6855_s5 + $0x174] ss:$8 sps:$4 sm:$0xff]  }
 0x4e9   : > { %4473 = vmatmul.mubr.msk.bf16.gmra.mrb[64].mxu1 %vm2458_vm5, %v6319_v38  ;;  %v3012_v35 = vsel %vm2474_vm4, %v4555_v33, 0 }
 0x4ea   : > { %2543 = vmatprep.mubr.bf16.mxu1 %v5563_v2  ;;  %2666 = vmatpush1.bf16.msra.mxu1 %v5387_v37  ;;  %v5426_v37 = vld [vmem:[%s6855_s5 + $0x160] ss:$8 sps:$4 sm:$0xff]  }
 0x4eb   : > { %4499 = vmatprep.subr.msk.bf16.mxu1 %vm2474_vm4, %v4498_v40  ;;  %v5429_v40 = vld [vmem:[%s6855_s5 + $0x170] ss:$8 sps:$4 sm:$0xff]  }
 0x4ec   : > { %v2344_v44 = vpop.f32.mrb[40].mxu1 }
 0x4ed   : > { %v6329_v45 = vpack.c.bf16 %v2344_v44, %v2339_v36  ;;  %v2346_v46 = vpop.f32.mrb[41].mxu1  ;;  %v5428_v36 = vld [vmem:[%s6855_s5 + $0x164] ss:$8 sps:$4 sm:$0xff]  }
 0x4ee   : > { %v2347_v47 = vpop.f32.mrb[42].mxu1  ;;  %2668 = vmatpush1.bf16.msra.mxu1 %v2652_v42  ;;  %v5432_v42 = vld [vmem:[%s6855_s5 + $0x180] ss:$8 sps:$4 sm:$0xff]   ;;  %v4573_v46 = vld [vmem:[%s6855_s5 + $0x1b0] sm:$0x33] }
 0x4ef   : > { %v6331_v48 = vpack.c.bf16 %v2347_v47, %v2344_v44  ;;  %v2349_v49 = vpop.f32.mrb[43].mxu1  ;;  %2837 = vmatprep.subr.bf16.mxu1 %v5394_v43  ;;  %v5435_v43 = vld [vmem:[%s6855_s5 + $0x190] ss:$8 sps:$4 sm:$0xff]   ;;  %v5440_v44 = vld [vmem:[%s6855_s5 + $0x1a4] ss:$8 sps:$4 sm:$0xff]  }
 0x4f0   : > { %v4584_v49 = vcombine.low %v4573_v46, %v4573_v46 }
 0x4f1   : > { %4474 = vmatmul.mubr.msk.bf16.gmra.mrb[68].mxu1 %vm2458_vm5, %v6331_v48 }
 0x4f2   : > { %2553 = vmatprep.mubr.bf16.mxu1 %v5563_v2 }
 0x4f4   : > { %v2352_v50 = vpop.f32.mrb[44].mxu1 }
 0x4f5   : > { %v6336_v51 = vpack.c.bf16 %v2352_v50, %v2347_v47  ;;  %v2354_v27 = vpop.f32.mrb[45].mxu1  ;;  %v4585_v47 = vcombine.high %v4573_v46, %v4573_v46 }
 0x4f6   : > { %v2355_v28 = vpop.f32.mrb[46].mxu1 }
 0x4f7   : > { %v6338_v52 = vpack.c.bf16 %v2355_v28, %v2352_v50  ;;  %v2357_v53 = vpop.f32.mrb[47].mxu1  ;;  %v3192_v50 = vsel %vm2474_vm4, %v4584_v49, 0 }
 0x4f9   : > { %4475 = vmatmul.mubr.msk.bf16.gmra.mrb[72].mxu1 %vm2458_vm5, %v6338_v52 }
 0x4fa   : > { %2689 = vmatprep.mubr.bf16.mxu1 %v5563_v2 }
 0x4fc   : > { %v2360_v54 = vpop.f32.mrb[48].mxu1 }
 0x4fd   : > { %v6343_v55 = vpack.c.bf16 %v2360_v54, %v2355_v28  ;;  %v2362_v56 = vpop.f32.mrb[49].mxu1 }
 0x4fe   : > { %v6348_v58 = vpop.f32.mrb[50].mxu1 }
 0x4ff   : > { %v6354_v60 = vpack.c.bf16 %v6348_v58, %v2360_v54  ;;  %v2365_v61 = vpop.f32.mrb[51].mxu1 }
 0x501   : > { %4500 = vmatmul.mubr.msk.bf16.vlgmr.msra.gmra.mrb[56].mxu1 %vm2458_vm5, %v2576_v18  ;;  %v5414_v18 = vld [vmem:[%s6855_s5 + $0x11c] ss:$8 sps:$4 sm:$0xff]  }
 0x502   : > { %2838 = vmatpush1.bf16.msra.mxu1 %v5392_v57  ;;  %2699 = vmatprep.mubr.bf16.mxu1 %v5563_v2 }
 0x503   : > { %2839 = vmatprep.subr.bf16.mxu1 %v5397_v59 }
 0x504   : > { %v6364_v0 = vpop.f32.mrb[52].mxu1 }
 0x505   : > { %v2952_v1 = vpack.c.bf16 %v6364_v0, %v6348_v58  ;;  %v2370_v3 = vpop.f32.mrb[53].mxu1 }
 0x506   : > { %2840 = vmatpush1.bf16.msra.mxu1 %v5395_v62  ;;  %v6371_v5 = vpop.f32.mrb[54].mxu1 }
 0x507   : > { %2841 = vmatprep.subr.bf16.mxu1 %v5400_v63  ;;  %v3132_v7 = vpack.c.bf16 %v6371_v5, %v6364_v0  ;;  %v2373_v8 = vpop.f32.mrb[55].mxu1 }
 0x509   : > { %4501 = vmatmul.mubr.msk.bf16.gmra.mrb[60].mxu1 %vm2458_vm5, %v6314_v34 }
 0x50a   : > { %2709 = vmatprep.mubr.bf16.mxu1 %v5563_v2  ;;  %2842 = vmatpush1.bf16.msra.mxu1 %v5398_v4 }
 0x50b   : > { %2843 = vmatprep.subr.bf16.mxu1 %v5403_v6 }
 0x50e   : > { %2844 = vmatpush1.bf16.msra.mxu1 %v5401_v9 }
 0x50f   : > { %2845 = vmatprep.subr.bf16.mxu1 %v5406_v10 }
 0x511   : > { %4502 = vmatmul.mubr.msk.bf16.gmra.mrb[64].mxu1 %vm2458_vm5, %v6329_v45 }
 0x512   : > { %2719 = vmatprep.mubr.bf16.mxu1 %v5563_v2  ;;  %2846 = vmatpush1.bf16.msra.mxu1 %v5404_v12 }
 0x513   : > { %4528 = vmatprep.subr.msk.bf16.mxu1 %vm2474_vm4, %v4527_v13 }
 0x516   : > { %2848 = vmatpush1.bf16.msra.mxu1 %v2832_v15 }
 0x517   : > { %3017 = vmatprep.subr.bf16.mxu1 %v5411_v16 }
 0x519   : > { %4503 = vmatmul.mubr.msk.bf16.gmra.mrb[68].mxu1 %vm2458_vm5, %v6336_v51 }
 0x51a   : > { %2729 = vmatprep.mubr.bf16.mxu1 %v5563_v2 }
 0x521   : > { %4504 = vmatmul.mubr.msk.bf16.gmra.mrb[72].mxu1 %vm2458_vm5, %v6343_v55 }
 0x522   : > { %2869 = vmatprep.mubr.bf16.mxu1 %v5563_v2 }
 0x529   : > { %4529 = vmatmul.mubr.msk.bf16.vlgmr.msra.gmra.mrb[56].mxu1 %vm2458_vm5, %v6297_v22  ;;  %v5420_v22 = vld [vmem:[%s6855_s5 + $0x13c] ss:$8 sps:$4 sm:$0xff]  }
 0x52a   : > { %3018 = vmatpush1.bf16.msra.mxu1 %v5409_v17  ;;  %2879 = vmatprep.mubr.bf16.mxu1 %v5563_v2 }
 0x52b   : > { %3019 = vmatprep.subr.bf16.mxu1 %v5414_v18 }
 0x52e   : > { %3020 = vmatpush1.bf16.msra.mxu1 %v5412_v19 }
 0x52f   : > { %3021 = vmatprep.subr.bf16.mxu1 %v5417_v20 }
 0x531   : > { %4530 = vmatmul.mubr.msk.bf16.gmra.mrb[60].mxu1 %vm2458_vm5, %v6319_v38 }
 0x532   : > { %2889 = vmatprep.mubr.bf16.mxu1 %v5563_v2  ;;  %3022 = vmatpush1.bf16.msra.mxu1 %v5415_v21 }
 0x533   : > { %3023 = vmatprep.subr.bf16.mxu1 %v5420_v22 }
 0x536   : > { %3024 = vmatpush1.bf16.msra.mxu1 %v5418_v25 }
 0x537   : > { %3025 = vmatprep.subr.bf16.mxu1 %v5423_v29 }
 0x539   : > { %4531 = vmatmul.mubr.msk.bf16.gmra.mrb[64].mxu1 %vm2458_vm5, %v6331_v48 }
 0x53a   : > { %2899 = vmatprep.mubr.bf16.mxu1 %v5563_v2  ;;  %3026 = vmatpush1.bf16.msra.mxu1 %v5421_v31 }
 0x53b   : > { %4557 = vmatprep.subr.msk.bf16.mxu1 %vm2474_vm4, %v4556_v32 }
 0x53e   : > { %3028 = vmatpush1.bf16.msra.mxu1 %v3012_v35 }
 0x53f   : > { %3197 = vmatprep.subr.bf16.mxu1 %v5428_v36 }
 0x541   : > { %4532 = vmatmul.mubr.msk.bf16.gmra.mrb[68].mxu1 %vm2458_vm5, %v6338_v52 }
 0x542   : > { %2909 = vmatprep.mubr.bf16.mxu1 %v5563_v2 }
 0x549   : > { %4533 = vmatmul.mubr.msk.bf16.gmra.mrb[72].mxu1 %vm2458_vm5, %v6354_v60 }
 0x54a   : > { %3049 = vmatprep.mubr.bf16.mxu1 %v5563_v2 }
 0x551   : > { %4558 = vmatmul.mubr.msk.bf16.vlgmr.msra.gmra.mrb[56].mxu1 %vm2458_vm5, %v6314_v34  ;;  %v5437_v34 = vld [vmem:[%s6855_s5 + $0x194] ss:$8 sps:$4 sm:$0xff]  }
 0x552   : > { %3198 = vmatpush1.bf16.msra.mxu1 %v5426_v37  ;;  %3059 = vmatprep.mubr.bf16.mxu1 %v5563_v2 }
 0x553   : > { %3199 = vmatprep.subr.bf16.mxu1 %v5431_v39 }
 0x556   : > { %3200 = vmatpush1.bf16.msra.mxu1 %v5429_v40 }
 0x557   : > { %3201 = vmatprep.subr.bf16.mxu1 %v5434_v41 }
 0x559   : > { %4559 = vmatmul.mubr.msk.bf16.gmra.mrb[60].mxu1 %vm2458_vm5, %v6329_v45  ;;  %v5438_v45 = vld [vmem:[%s6855_s5 + $0x1a0] ss:$8 sps:$4 sm:$0xff]  }
 0x55a   : > { %3069 = vmatprep.mubr.bf16.mxu1 %v5563_v2  ;;  %3202 = vmatpush1.bf16.msra.mxu1 %v5432_v42 }
 0x55b   : > { %3203 = vmatprep.subr.bf16.mxu1 %v5437_v34 }
 0x55e   : > { %3204 = vmatpush1.bf16.msra.mxu1 %v5435_v43 }
 0x55f   : > { %3205 = vmatprep.subr.bf16.mxu1 %v5440_v44 }
 0x561   : > { %4560 = vmatmul.mubr.msk.bf16.gmra.mrb[64].mxu1 %vm2458_vm5, %v6336_v51 }
 0x562   : > { %3079 = vmatprep.mubr.bf16.mxu1 %v5563_v2  ;;  %3206 = vmatpush1.bf16.msra.mxu1 %v5438_v45 }
 0x563   : > { %4586 = vmatprep.subr.msk.bf16.mxu1 %vm2474_vm4, %v4585_v47 }
 0x566   : > { %3208 = vmatpush1.bf16.msra.mxu1 %v3192_v50 }
 0x569   : > { %4561 = vmatmul.mubr.msk.bf16.gmra.mrb[68].mxu1 %vm2458_vm5, %v6343_v55 }
 0x56a   : > { %3089 = vmatprep.mubr.bf16.mxu1 %v5563_v2 }
 0x571   : > { %4562 = vmatmul.mubr.msk.bf16.gmra.mrb[72].mxu1 %vm2458_vm5, %v2952_v1 }
 0x572   : > { %3229 = vmatprep.mubr.bf16.mxu1 %v5563_v2 }
 0x579   : > { %4587 = vmatmul.mubr.msk.bf16.vlgmr.msra.gmra.mrb[56].mxu1 %vm2458_vm5, %v6319_v38  ;;  %v2391_v38 = vld [vmem:[%s6856_s6] sm:$0x3] }
 0x57a   : > { %3239 = vmatprep.mubr.bf16.mxu1 %v5563_v2  ;;  %v6532_v51 = vrot.slane %v2391_v38, %v552_v26 }
 0x581   : > { %4588 = vmatmul.mubr.msk.bf16.gmra.mrb[60].mxu1 %vm2458_vm5, %v6331_v48  ;;  %v6528_v48 = vrot.slane %v2391_v38, %v548_v24 }
 0x582   : > { %3249 = vmatprep.mubr.bf16.mxu1 %v5563_v2 }
 0x589   : > { %4589 = vmatmul.mubr.msk.bf16.gmra.mrb[64].mxu1 %vm2458_vm5, %v6338_v52 }
 0x58a   : > { %3259 = vmatprep.mubr.bf16.mxu1 %v5563_v2 }
 0x591   : > { %4590 = vmatmul.mubr.msk.bf16.gmra.mrb[68].mxu1 %vm2458_vm5, %v6354_v60 }
 0x592   : > { %3269 = vmatprep.mubr.bf16.mxu1 %v5563_v2 }
 0x599   : > { %4591 = vmatmul.mubr.msk.bf16.gmra.mrb[72].mxu1 %vm2458_vm5, %v3132_v7 }
 0x59a   : > { %3390 = vmatprep.mubr.bf16.mxu1 %v5563_v2 }
 0x64c   : > { %v3231_v27 = vpop.f32.mrb[56].mxu1 }
 0x64d   : > { %v4913_v28 = vadd.f32 %v3231_v27, %v6528_v48  ;;  %v3233_v52 = vpop.f32.mrb[57].mxu1 }
 0x64e   : > { %v4914_v53 = vadd.f32 %v3233_v52, %v6532_v51  ;;  %v3235_v54 = vpop.f32.mrb[58].mxu1 }
 0x64f   : > { %v4915_v55 = vadd.f32 %v3235_v54, %v6528_v48  ;;  %v3237_v56 = vpop.f32.mrb[59].mxu1  ;;  %v3300_v58 = vmax.f32 %v4913_v28, 0.0 }
 0x650   : > { %v4916_v57 = vadd.f32 %v3237_v56, %v6532_v51  ;;  %v3301_v24 = vmax.f32 %v4914_v53, 0.0 }
 0x651   : > { %v3302_v59 = vmax.f32 %v4915_v55, 0.0 }
 0x652   : > { %v3303_v60 = vmax.f32 %v4916_v57, 0.0 }
 0x653   : > { %v3325_v61 = vpack.c.bf16 %v3302_v59, %v3300_v58  ;;  %v5443_v59 = vld [vmem:[%s6857_s7] sm:$0xff]  }
 0x654   : > { %v3326_v23 = vpack.c.bf16 %v3303_v60, %v3301_v24  ;;  %v3241_v26 = vpop.f32.mrb[60].mxu1  ;;  %v5444_v24 = vld [vmem:[%s6857_s7 + $0x8] sm:$0xff]   ;;  %v5448_v60 = vld [vmem:[%s6858_s8 + $0x10] sm:$0xff]  }
 0x655   : > { %v4917_v62 = vadd.f32 %v3241_v26, %v6528_v48  ;;  %v3243_v63 = vpop.f32.mrb[61].mxu1  ;;  %v5450_v26 = vld [vmem:[%s6858_s8 + $0x20] sm:$0xff]  }
 0x656   : > { %v4918_v0 = vadd.f32 %v3243_v63, %v6532_v51  ;;  %v3245_v1 = vpop.f32.mrb[62].mxu1  ;;  %3358 = vmatprep.subr.bf16.mxu1 %v3326_v23  ;;  %v5445_v23 = vld [vmem:[%s6857_s7 + $0x10] ss:$0 sps:$4 sm:$0xff]  }
 0x657   : > { %v4919_v3 = vadd.f32 %v3245_v1, %v6528_v48  ;;  %v3247_v4 = vpop.f32.mrb[63].mxu1  ;;  %3359 = vmatpush1.bf16.msra.mxu1 %v3325_v61  ;;  %v3304_v6 = vmax.f32 %v4917_v62, 0.0  ;;  %v5449_v61 = vld [vmem:[%s6858_s8 + $0x18] sm:$0xff]   ;;  %v5451_v62 = vld [vmem:[%s6858_s8 + $0x28] sm:$0xff]   ;;  %v5452_v63 = vld [vmem:[%s6858_s8 + $0x30] sm:$0xff]  }
 0x658   : > { %v4920_v5 = vadd.f32 %v3247_v4, %v6532_v51  ;;  %v3305_v8 = vmax.f32 %v4918_v0, 0.0  ;;  %v5453_v0 = vld [vmem:[%s6858_s8 + $0x38] sm:$0xff]   ;;  %v5454_v1 = vld [vmem:[%s6858_s8 + $0x40] sm:$0xff]   ;;  %v5564_v4 = vmov 0.0  }
 0x659   : > { %v3306_v7 = vmax.f32 %v4919_v3, 0.0  ;;  %v5455_v3 = vld [vmem:[%s6858_s8 + $0x48] sm:$0xff]   ;;  %4841 = vmatprep.subr.bf16.mxu0 %v5564_v4  ;;  %4853 = vmatprep.mubr.msk.bf16.mxu0 %vm5565_vm7, %v5564_v4 }
 0x65a   : > { %v3307_v9 = vmax.f32 %v4920_v5, 0.0 }
 0x65b   : > { %v3327_v10 = vpack.c.bf16 %v3306_v7, %v3304_v6 }
 0x65c   : > { %v3328_v11 = vpack.c.bf16 %v3307_v9, %v3305_v8  ;;  %v3251_v12 = vpop.f32.mrb[64].mxu1 }
 0x65d   : > { %v4921_v13 = vadd.f32 %v3251_v12, %v6528_v48  ;;  %v3253_v14 = vpop.f32.mrb[65].mxu1  ;;  %v5457_v12 = vld [vmem:[%s6859_s9 + $0x8] sm:$0xff]  }
 0x65e   : > { %v4922_v15 = vadd.f32 %v3253_v14, %v6532_v51  ;;  %v3255_v16 = vpop.f32.mrb[66].mxu1  ;;  %3360 = vmatprep.subr.bf16.mxu1 %v3328_v11 }
 0x65f   : > { %v4923_v17 = vadd.f32 %v3255_v16, %v6528_v48  ;;  %v3257_v18 = vpop.f32.mrb[67].mxu1  ;;  %3361 = vmatpush1.bf16.msra.mxu1 %v3327_v10  ;;  %v3308_v20 = vmax.f32 %v4921_v13, 0.0 }
 0x660   : > { %v4924_v19 = vadd.f32 %v3257_v18, %v6532_v51  ;;  %v3309_v22 = vmax.f32 %v4922_v15, 0.0  ;;  %v5458_v18 = vld [vmem:[%s6859_s9 + $0x10] sm:$0xff]  }
 0x661   : > { %v3310_v21 = vmax.f32 %v4923_v17, 0.0 }
 0x662   : > { %v3311_v25 = vmax.f32 %v4924_v19, 0.0 }
 0x663   : > { %v3329_v29 = vpack.c.bf16 %v3310_v21, %v3308_v20  ;;  %v5459_v20 = vld [vmem:[%s6859_s9 + $0x18] sm:$0xff]  }
 0x664   : > { %v3330_v30 = vpack.c.bf16 %v3311_v25, %v3309_v22  ;;  %v3261_v31 = vpop.f32.mrb[68].mxu1 }
 0x665   : > { %v4925_v32 = vadd.f32 %v3261_v31, %v6528_v48  ;;  %v3263_v33 = vpop.f32.mrb[69].mxu1  ;;  %v5460_v31 = vld [vmem:[%s6859_s9 + $0x20] sm:$0xff]  }
 0x666   : > { %v4926_v35 = vadd.f32 %v3263_v33, %v6532_v51  ;;  %v3265_v36 = vpop.f32.mrb[70].mxu1  ;;  %3362 = vmatprep.subr.bf16.mxu1 %v3330_v30  ;;  %v5461_v33 = vld [vmem:[%s6859_s9 + $0x28] sm:$0xff]  }
 0x667   : > { %v4927_v37 = vadd.f32 %v3265_v36, %v6528_v48  ;;  %v3267_v39 = vpop.f32.mrb[71].mxu1  ;;  %3363 = vmatpush1.bf16.msra.mxu1 %v3329_v29  ;;  %v3312_v41 = vmax.f32 %v4925_v32, 0.0 }
 0x668   : > { %v4928_v40 = vadd.f32 %v3267_v39, %v6532_v51  ;;  %v3313_v34 = vmax.f32 %v4926_v35, 0.0 }
 0x669   : > { %v3314_v42 = vmax.f32 %v4927_v37, 0.0 }
 0x66a   : > { %v3315_v43 = vmax.f32 %v4928_v40, 0.0  ;;  %v5462_v40 = vld [vmem:[%s6859_s9 + $0x30] sm:$0xff]  }
 0x66b   : > { %v3331_v44 = vpack.c.bf16 %v3314_v42, %v3312_v41  ;;  %v5463_v41 = vld [vmem:[%s6859_s9 + $0x38] sm:$0xff]  }
 0x66c   : > { %v3332_v46 = vpack.c.bf16 %v3315_v43, %v3313_v34  ;;  %v3271_v45 = vpop.f32.mrb[72].mxu1 }
 0x66d   : > { %v4929_v47 = vadd.f32 %v3271_v45, %v6528_v48  ;;  %v3273_v49 = vpop.f32.mrb[73].mxu1  ;;  %v5465_v45 = vld [vmem:[%s6859_s9 + $0x48] sm:$0xff]  }
 0x66e   : > { %v4930_v50 = vadd.f32 %v3273_v49, %v6532_v51  ;;  %v3275_v38 = vpop.f32.mrb[74].mxu1  ;;  %3364 = vmatprep.subr.bf16.mxu1 %v3332_v46  ;;  %v5464_v46 = vld [vmem:[%s6859_s9 + $0x40] sm:$0xff]  }
 0x66f   : > { %v4931_v27 = vadd.f32 %v3275_v38, %v6528_v48  ;;  %v3277_v28 = vpop.f32.mrb[75].mxu1  ;;  %3365 = vmatpush1.bf16.msra.mxu1 %v3331_v44  ;;  %v3316_v53 = vmax.f32 %v4929_v47, 0.0  ;;  %v5446_v48 = vld [vmem:[%s6858_s8] sm:$0xff]  }
 0x670   : > { %v4932_v52 = vadd.f32 %v3277_v28, %v6532_v51  ;;  %v3317_v55 = vmax.f32 %v4930_v50, 0.0  ;;  %v5447_v51 = vld [vmem:[%s6858_s8 + $0x8] sm:$0xff]  }
 0x671   : > { %v3318_v54 = vmax.f32 %v4931_v27, 0.0  ;;  %v5466_v27 = vld [vmem:[%s6859_s9 + $0x50] sm:$0xff]  }
 0x672   : > { %v3319_v56 = vmax.f32 %v4932_v52, 0.0  ;;  %v5467_v52 = vld [vmem:[%s6859_s9 + $0x58] sm:$0xff]  }
 0x673   : > { %v3333_v57 = vpack.c.bf16 %v3318_v54, %v3316_v53  ;;  %v5468_v53 = vld [vmem:[%s6859_s9 + $0x60] sm:$0xff]   ;;  %v5469_v54 = vld [vmem:[%s6859_s9 + $0x68] sm:$0xff]  }
 0x674   : > { %v3334_v58 = vpack.c.bf16 %v3319_v56, %v3317_v55  ;;  %v5470_v55 = vld [vmem:[%s6859_s9 + $0x70] sm:$0xff]   ;;  %v5471_v56 = vld [vmem:[%s6859_s9 + $0x78] sm:$0xff]  }
 0x676   : > { %3366 = vmatprep.subr.bf16.mxu1 %v3334_v58  ;;  %v5472_v58 = vld [vmem:[%s6859_s9 + $0x80] sm:$0xff]  }
 0x677   : > { %3367 = vmatpush1.bf16.msra.mxu1 %v3333_v57 }
 0x678   : > { %3514 = vmatprep.subr.bf16.mxu1 %v5563_v2 }
 0x67a   : > { %4595 = vmatmul.mubr.msk.bf16.vlgmr.msra.gmra.mrb[76].mxu1 %vm3348_vm6, %v5443_v59  ;;  %v5473_v59 = vld [vmem:[%s6859_s9 + $0x88] sm:$0xff]  }
 0x67b   : > { %3400 = vmatprep.mubr.bf16.mxu1 %v5563_v2  ;;  %3515 = vmatpush1.bf16.msra.mxu1 %v5446_v48  ;;  %v5474_v48 = vld [vmem:[%s6859_s9 + $0x90] sm:$0xff]  }
 0x67c   : > { %3516 = vmatprep.subr.bf16.mxu1 %v5563_v2 }
 0x67f   : > { %3517 = vmatpush1.bf16.msra.mxu1 %v5447_v51  ;;  %v5475_v51 = vld [vmem:[%s6859_s9 + $0x98] sm:$0xff]  }
 0x680   : > { %3518 = vmatprep.subr.bf16.mxu1 %v5563_v2 }
 0x682   : > { %4596 = vmatmul.mubr.msk.bf16.gmra.mrb[80].mxu1 %vm3348_vm6, %v5444_v24  ;;  %v5476_v24 = vld [vmem:[%s6859_s9 + $0xa0] sm:$0xff]  }
 0x683   : > { %3410 = vmatprep.mubr.bf16.mxu1 %v5563_v2  ;;  %3519 = vmatpush1.bf16.msra.mxu1 %v5448_v60 }
 0x684   : > { %3520 = vmatprep.subr.bf16.mxu1 %v5563_v2 }
 0x687   : > { %3521 = vmatpush1.bf16.msra.mxu1 %v5449_v61  ;;  %v5477_v61 = vld [vmem:[%s6859_s9 + $0xa8] sm:$0xff]  }
 0x688   : > { %3522 = vmatprep.subr.bf16.mxu1 %v5563_v2 }
 0x68a   : > { %4597 = vmatmul.mubr.msk.bf16.gmra.mrb[84].mxu1 %vm3348_vm6, %v5445_v23  ;;  %v5478_v23 = vld [vmem:[%s6859_s9 + $0xb0] sm:$0xff]  }
 0x68b   : > { %3523 = vmatpush1.bf16.msra.mxu1 %v5450_v26  ;;  %v5479_v26 = vld [vmem:[%s6859_s9 + $0xb8] sm:$0xff]  }
 0x68c   : > { %3524 = vmatprep.subr.bf16.mxu1 %v5563_v2 }
 0x68f   : > { %3525 = vmatpush1.bf16.msra.mxu1 %v5451_v62  ;;  %v5480_v62 = vld [vmem:[%s6859_s9 + $0xc0] sm:$0xff]  }
 0x690   : > { %3526 = vmatprep.subr.bf16.mxu1 %v5563_v2 }
 0x693   : > { %3527 = vmatpush1.bf16.msra.mxu1 %v5452_v63  ;;  %v5481_v63 = vld [vmem:[%s6861_s11] sm:$0xff]  }
 0x694   : > { %3528 = vmatprep.subr.bf16.mxu1 %v5563_v2 }
 0x697   : > { %3529 = vmatpush1.bf16.msra.mxu1 %v5453_v0 }
 0x698   : > { %3530 = vmatprep.subr.bf16.mxu1 %v5563_v2 }
 0x69b   : > { %3531 = vmatpush1.bf16.msra.mxu1 %v5454_v1  ;;  %v5482_v1 = vld [vmem:[%s6861_s11 + $0x8] sm:$0xff]  }
 0x69c   : > { %3532 = vmatprep.subr.bf16.mxu1 %v5563_v2  ;;  %v5456_v2 = vld [vmem:[%s6859_s9] sm:$0xff]  }
 0x69f   : > { %3533 = vmatpush1.bf16.msra.mxu1 %v5455_v3  ;;  %v5483_v3 = vld [vmem:[%s6861_s11 + $0x10] sm:$0xff]  }
 0x6a0   : > { %4751 = vmatprep.subr.bf16.mxu1 %v5564_v4 }
 0x74d   : > { %v3392_v5 = vpop.f32.mrb[76].mxu1 }
 0x74e   : > { %v3394_v6 = vpop.f32.mrb[77].mxu1 }
 0x74f   : > { %v3396_v7 = vpop.f32.mrb[78].mxu1 }
 0x750   : > { %v3439_v8 = vpack.c.bf16 %v3396_v7, %v3392_v5  ;;  %v3398_v9 = vpop.f32.mrb[79].mxu1  ;;  %v5484_v5 = vld [vmem:[%s6861_s11 + $0x18] sm:$0xff]   ;;  %v5486_v7 = vld [vmem:[%s6861_s11 + $0x28] sm:$0xff]  }
 0x751   : > { %v3440_v10 = vpack.c.bf16 %v3398_v9, %v3394_v6  ;;  %v5485_v6 = vld [vmem:[%s6861_s11 + $0x20] sm:$0xff]   ;;  %v5488_v9 = vld [vmem:[%s6861_s11 + $0x38] ss:$0 sps:$4 sm:$0xff]  }
 0x753   : > { %4608 = vmatprep.mubr.msk.bf16.mxu1 %vm576_vm0, %v3440_v10  ;;  %v4079_v10 = vsel %vm2282_vm2, %v5488_v9, 0 }
 0x754   : > { %3547 = vmatmul.mubr.bf16.vlgmr.msra.gmra.mrb[88].mxu1 %v3439_v8  ;;  %v5487_v8 = vld [vmem:[%s6861_s11 + $0x30] sm:$0xff]  }
 0x755   : > { %v3402_v11 = vpop.f32.mrb[80].mxu1  ;;  %4752 = vmatpush3.bf16.msra.mxu1 %v5456_v2  ;;  %v5489_v2 = vld [vmem:[%s6863_s13] sm:$0xff]  }
 0x756   : > { %v3404_v13 = vpop.f32.mrb[81].mxu1  ;;  %4753 = vmatprep.subr.bf16.mxu1 %v5564_v4  ;;  %4842 = vmatpush3.bf16.msra.mxu0 %v5489_v2 }
 0x757   : > { %v3406_v14 = vpop.f32.mrb[82].mxu1  ;;  %4843 = vmatprep.subr.bf16.mxu0 %v5564_v4 }
 0x758   : > { %v3441_v15 = vpack.c.bf16 %v3406_v14, %v3402_v11  ;;  %v3408_v16 = vpop.f32.mrb[83].mxu1  ;;  %v5490_v11 = vld [vmem:[%s6863_s13 + $0x8] sm:$0xff]   ;;  %v5493_v14 = vld [vmem:[%s6863_s13 + $0x20] sm:$0xff]  }
 0x759   : > { %v3442_v17 = vpack.c.bf16 %v3408_v16, %v3404_v13  ;;  %4754 = vmatpush3.bf16.msra.mxu1 %v5457_v12  ;;  %v5491_v12 = vld [vmem:[%s6863_s13 + $0x10] sm:$0xff]   ;;  %v5492_v13 = vld [vmem:[%s6863_s13 + $0x18] sm:$0xff]  }
 0x75a   : > { %4755 = vmatprep.subr.bf16.mxu1 %v5564_v4  ;;  %4844 = vmatpush3.bf16.msra.mxu0 %v5490_v11 }
 0x75b   : > { %4609 = vmatprep.mubr.msk.bf16.mxu1 %vm576_vm0, %v3442_v17  ;;  %4845 = vmatprep.subr.bf16.mxu0 %v5564_v4 }
 0x75c   : > { %3555 = vmatmul.mubr.bf16.gmra.mrb[92].mxu1 %v3441_v15  ;;  %v4611_v15 = vld [vmem:[%s6860_s10] ss:$0 sm:$0xff] }
 0x75d   : > { %v3412_v19 = vpop.f32.mrb[84].mxu1  ;;  %4756 = vmatpush3.bf16.msra.mxu1 %v5458_v18 }
 0x75e   : > { %v3414_v21 = vpop.f32.mrb[85].mxu1  ;;  %4757 = vmatprep.subr.bf16.mxu1 %v5564_v4  ;;  %v3443_v29 = vpack.c.bf16 %v3412_v19, %v3412_v19  ;;  %4846 = vmatpush3.bf16.msra.mxu0 %v5491_v12 }
 0x75f   : > { %v3444_v22 = vpack.c.bf16 %v3414_v21, %v3414_v21  ;;  %v3416_v25 = vpop.f32.mrb[86].mxu1  ;;  %4847 = vmatprep.subr.bf16.mxu0 %v5564_v4 }
 0x760   : > { %v3417_v30 = vpop.f32.mrb[87].mxu1  ;;  %v5494_v25 = vld [vmem:[%s6863_s13 + $0x28] ss:$0 sps:$4 sm:$0x33]  }
 0x761   : > { %4610 = vmatprep.mubr.msk.bf16.mxu1 %vm576_vm0, %v3444_v22  ;;  %4758 = vmatpush3.bf16.msra.mxu1 %v5459_v20 }
 0x762   : > { %4759 = vmatprep.subr.bf16.mxu1 %v5564_v4  ;;  %4848 = vmatpush3.bf16.msra.mxu0 %v5492_v13 }
 0x763   : > { %4849 = vmatprep.subr.bf16.mxu0 %v5564_v4 }
 0x764   : > { %3563 = vmatmul.mubr.bf16.gmra.mrb[96].mxu1 %v3443_v29  ;;  %v4172_v29 = vsel %vm2474_vm4, %v5494_v25, 0 }
 0x765   : > { %4760 = vmatpush3.bf16.msra.mxu1 %v5460_v31  ;;  %4761 = vmatprep.mubr.msk.bf16.mxu1 %vm5565_vm7, %v5564_v4 }
 0x766   : > { %4765 = vmatprep.subr.bf16.mxu1 %v5564_v4  ;;  %4850 = vmatpush3.bf16.msra.mxu0 %v5493_v14 }
 0x767   : > { %4851 = vmatprep.subr.bf16.mxu0 %v5564_v4 }
 0x76a   : > { %4852 = vmatpush3.bf16.msra.mxu0 %v4172_v29 }
 0x827   : > { %v3548_v32 = vpop.f32.mrb[88].mxu1 }
 0x828   : > { %v3580_v35 = vpack.c.bf16 %v3548_v32, %v3548_v32  ;;  %v3550_v36 = vpop.f32.mrb[89].mxu1 }
 0x829   : > { %v3551_v37 = vpop.f32.mrb[90].mxu1 }
 0x82a   : > { %v3553_v39 = vpop.f32.mrb[91].mxu1  ;;  %4762 = vmatmul.mubr.msk.bf16.vlgmr.msra.gmra.mrb[100].mxu1 %vm3348_vm6, %v3580_v35  ;;  %v3672_v28 = vpack.c.bf16 %v3551_v37, %v3551_v37 }
 0x82b   : > { %4766 = vmatpush3.bf16.msra.mxu1 %v5461_v33  ;;  %4775 = vmatprep.mubr.msk.bf16.mxu1 %vm5565_vm7, %v5564_v4 }
 0x82c   : > { %4767 = vmatprep.subr.bf16.mxu1 %v5564_v4 }
 0x82f   : > { %4768 = vmatpush3.bf16.msra.mxu1 %v5462_v40  ;;  %v3556_v42 = vpop.f32.mrb[92].mxu1 }
 0x830   : > { %4769 = vmatprep.subr.bf16.mxu1 %v5564_v4  ;;  %v3558_v34 = vpop.f32.mrb[93].mxu1  ;;  %v3758_v57 = vpack.c.bf16 %v3556_v42, %v3556_v42 }
 0x831   : > { %v3559_v43 = vpop.f32.mrb[94].mxu1 }
 0x832   : > { %v3561_v44 = vpop.f32.mrb[95].mxu1  ;;  %v3844_v60 = vpack.c.bf16 %v3559_v43, %v3559_v43 }
 0x833   : > { %4770 = vmatpush3.bf16.msra.mxu1 %v5463_v41 }
 0x834   : > { %4771 = vmatprep.subr.bf16.mxu1 %v5564_v4 }
 0x837   : > { %4772 = vmatpush3.bf16.msra.mxu1 %v5464_v46  ;;  %v6658_v47 = vpop.f32.mrb[96].mxu1  ;;  %v4699_v46 = vld [vmem:[%s6864_s14] ss:$0 sm:$0xff] }
 0x838   : > { %4773 = vmatprep.subr.bf16.mxu1 %v5564_v4  ;;  %v3566_v49 = vpop.f32.mrb[97].mxu1  ;;  %v3930_v0 = vpack.c.bf16 %v6658_v47, %v6658_v47 }
 0x839   : > { %v3567_v50 = vpop.f32.mrb[98].mxu1 }
 0x83a   : > { %v3568_v38 = vpop.f32.mrb[99].mxu1 }
 0x83b   : > { %4774 = vmatpush3.bf16.msra.mxu1 %v5465_v45 }
 0x83c   : > { %4779 = vmatprep.subr.bf16.mxu1 %v5564_v4 }
 0x83e   : > { %4776 = vmatmul.mubr.msk.bf16.vlgmr.msra.gmra.mrb[100].mxu1 %vm3348_vm6, %v3672_v28 }
 0x83f   : > { %4780 = vmatpush3.bf16.msra.mxu1 %v5466_v27  ;;  %4789 = vmatprep.mubr.msk.bf16.mxu1 %vm5565_vm7, %v5564_v4 }
 0x840   : > { %4781 = vmatprep.subr.bf16.mxu1 %v5564_v4 }
 0x843   : > { %4782 = vmatpush3.bf16.msra.mxu1 %v5467_v52 }
 0x844   : > { %4783 = vmatprep.subr.bf16.mxu1 %v5564_v4 }
 0x847   : > { %4784 = vmatpush3.bf16.msra.mxu1 %v5468_v53 }
 0x848   : > { %4785 = vmatprep.subr.bf16.mxu1 %v5564_v4 }
 0x84b   : > { %4786 = vmatpush3.bf16.msra.mxu1 %v5469_v54 }
 0x84c   : > { %4787 = vmatprep.subr.bf16.mxu1 %v5564_v4 }
 0x84f   : > { %4788 = vmatpush3.bf16.msra.mxu1 %v5470_v55 }
 0x850   : > { %4793 = vmatprep.subr.bf16.mxu1 %v5564_v4 }
 0x852   : > { %4790 = vmatmul.mubr.msk.bf16.vlgmr.msra.gmra.mrb[100].mxu1 %vm3348_vm6, %v3758_v57 }
 0x853   : > { %4794 = vmatpush3.bf16.msra.mxu1 %v5471_v56  ;;  %4803 = vmatprep.mubr.msk.bf16.mxu1 %vm5565_vm7, %v5564_v4 }
 0x854   : > { %4795 = vmatprep.subr.bf16.mxu1 %v5564_v4 }
 0x857   : > { %4796 = vmatpush3.bf16.msra.mxu1 %v5472_v58 }
 0x858   : > { %4797 = vmatprep.subr.bf16.mxu1 %v5564_v4 }
 0x85b   : > { %4798 = vmatpush3.bf16.msra.mxu1 %v5473_v59 }
 0x85c   : > { %4799 = vmatprep.subr.bf16.mxu1 %v5564_v4 }
 0x85f   : > { %4800 = vmatpush3.bf16.msra.mxu1 %v5474_v48 }
 0x860   : > { %4801 = vmatprep.subr.bf16.mxu1 %v5564_v4 }
 0x863   : > { %4802 = vmatpush3.bf16.msra.mxu1 %v5475_v51 }
 0x864   : > { %4807 = vmatprep.subr.bf16.mxu1 %v5564_v4 }
 0x866   : > { %4804 = vmatmul.mubr.msk.bf16.vlgmr.msra.gmra.mrb[100].mxu1 %vm3348_vm6, %v3844_v60 }
 0x867   : > { %4808 = vmatpush3.bf16.msra.mxu1 %v5476_v24  ;;  %4817 = vmatprep.mubr.msk.bf16.mxu1 %vm5565_vm7, %v5564_v4 }
 0x868   : > { %4809 = vmatprep.subr.bf16.mxu1 %v5564_v4 }
 0x86b   : > { %4810 = vmatpush3.bf16.msra.mxu1 %v5477_v61 }
 0x86c   : > { %4811 = vmatprep.subr.bf16.mxu1 %v5564_v4 }
 0x86f   : > { %4812 = vmatpush3.bf16.msra.mxu1 %v5478_v23 }
 0x870   : > { %4813 = vmatprep.subr.bf16.mxu1 %v5564_v4 }
 0x873   : > { %4814 = vmatpush3.bf16.msra.mxu1 %v5479_v26 }
 0x874   : > { %4815 = vmatprep.subr.bf16.mxu1 %v5564_v4 }
 0x877   : > { %4816 = vmatpush3.bf16.msra.mxu1 %v5480_v62 }
 0x878   : > { %4821 = vmatprep.subr.bf16.mxu1 %v5564_v4 }
 0x87a   : > { %4818 = vmatmul.mubr.msk.bf16.vlgmr.msra.gmra.mrb[100].mxu1 %vm3348_vm6, %v3930_v0 }
 0x87b   : > { %4822 = vmatpush3.bf16.msra.mxu1 %v5481_v63  ;;  %4837 = vmatprep.mubr.msk.bf16.mxu1 %vm5565_vm7, %v5564_v4 }
 0x87c   : > { %4823 = vmatprep.subr.bf16.mxu1 %v5564_v4 }
 0x87f   : > { %4824 = vmatpush3.bf16.msra.mxu1 %v5482_v1 }
 0x880   : > { %4825 = vmatprep.subr.bf16.mxu1 %v5564_v4 }
 0x883   : > { %4826 = vmatpush3.bf16.msra.mxu1 %v5483_v3 }
 0x884   : > { %4827 = vmatprep.subr.bf16.mxu1 %v5564_v4 }
 0x887   : > { %4828 = vmatpush3.bf16.msra.mxu1 %v5484_v5 }
 0x888   : > { %4829 = vmatprep.subr.bf16.mxu1 %v5564_v4 }
 0x88b   : > { %4830 = vmatpush3.bf16.msra.mxu1 %v5485_v6 }
 0x88c   : > { %4831 = vmatprep.subr.bf16.mxu1 %v5564_v4 }
 0x88f   : > { %4832 = vmatpush3.bf16.msra.mxu1 %v5486_v7 }
 0x890   : > { %4833 = vmatprep.subr.bf16.mxu1 %v5564_v4 }
 0x893   : > { %4834 = vmatpush3.bf16.msra.mxu1 %v5487_v8 }
 0x894   : > { %4835 = vmatprep.subr.bf16.mxu1 %v5564_v4  ;;  %v4682_v4 = vld [vmem:[%s6862_s12] ss:$0 sm:$0xff] }
 0x897   : > { %4836 = vmatpush3.bf16.msra.mxu1 %v4079_v10 }
 0x94d   : > { %v3998_v16 = vpop.f32.mrb[100].mxu1 }
 0x94e   : > { %v4933_v17 = vadd.f32 %v4611_v15, %v3998_v16  ;;  %v4819_v18 = vpop.f32.mrb[101].mxu1 }
 0x94f   : > { %v4001_v19 = vpop.f32.mrb[102].mxu1 }
 0x950   : > { %v4005_v20 = vmax.f32 %v4933_v17, 0.0  ;;  %v4820_v21 = vpop.f32.mrb[103].mxu1 }
 0x952   : > { %v4021_v22 = vpack.c.bf16 %v4005_v20, %v4005_v20 }
 0x954   : > { %4838 = vmatmul.mubr.msk.bf16.vlgmr.msra.gmra.mrb[104].mxu1 %vm4074_vm8, %v4021_v22 }
 0xa27   : > { %v4115_v30 = vpop.f32.mrb[104].mxu1 }
 0xa28   : > { %v4116_v31 = vadd.f32 %v4682_v4, %v4115_v30  ;;  %v4839_v32 = vpop.f32.mrb[105].mxu1 }
 0xa29   : > { %v4118_v33 = vpop.f32.mrb[106].mxu1 }
 0xa2a   : > { %5495 = vtanh.f32 %v4116_v31  ;;  %v4840_v35 = vpop.f32.mrb[107].mxu1 }
 0xa34   : > { %v5496_v36 = vpop.eup %5495 }
 0xa35   : > { %v4122_v37 = vmul.f32 1.7519, %v5496_v36 }
 0xa37   : > { %v4134_v39 = vpack.c.bf16 %v4122_v37, %v4122_v37  ;;  %v4214_v40 = vmul.f32 %v4122_v37, %v4122_v37 }
 0xa39   : > { %4854 = vmatmul.mubr.msk.bf16.vlgmr.msra.gmra.mrb[56].mxu0 %vm2458_vm5, %v4134_v39  ;;  %v4215_v41 = vsel %vm2458_vm5, %v4214_v40, 0.0 }
 0xa3a   : > { %4216 = vadd.xlane.f32.xlu0 %v4215_v41 }
 0xac7   : > { %v4217_v44 = vpop.xlane.xlu0 %4216 }
 0xb0c   : > { %v4208_v42 = vpop.f32.mrb[56].mxu0 }
 0xb0d   : > { %v4218_v34 = vmul.f32 2.0, %v4208_v42  ;;  %v4855_v43 = vpop.f32.mrb[57].mxu0 }
 0xb0e   : > { %v4211_v45 = vpop.f32.mrb[58].mxu0 }
 0xb0f   : > { %v4219_v47 = vsub.f32 %v4217_v44, %v4218_v34  ;;  %v4856_v49 = vpop.f32.mrb[59].mxu0 }
 0xb11   : > { %v4227_v50 = vadd.f32 %v4699_v46, %v4219_v47 }
 0xb13   : > { %v4228_v38 = vmul.f32 -0.05, %v4227_v50 }
 0xb15   : > { %v4229_v27 = vmul.f32 1.442695, %v4228_v38 }
 0xb17   : > { %5497 = vpow2.f32 %v4229_v27 }
 0xb21   : > { %v5498_v28 = vpop.eup %5497 }
 0xb22   : > { %4232 = vst.msk [vmem:[%s487_s27] sm:$0xff] %vm4231_vm9, %v5498_v28 }
 0xb23   : > { %5512 = shalt.err (!%p5509_p3)
}
 0xb24   : > { %s5513_s23 = scalar_lea.hbm %s6808_s26, 128  ;;  %s5517_s18 = scalar_lea.hbm %s6865_s15, 256 }
 0xb25   : > { %p5514_p4 = scmp.ne.s32.totalorder %s6808_s26, %s5513_s23  ;;  %p5518_p9 = scmp.lt.u32.totalorder %s6808_s26, %s6865_s15 }
 0xb26   : > { %p5519_p10 = scmp.lt.u32.totalorder %s5517_s18, %s5513_s23  ;;  %p5521_p12 = scmp.lt.u32.totalorder %s5513_s23, %s6808_s26 }
 0xb27   : > { %p5515_p7 = pnand %p5514_p4, %p5685_p5 }
 0xb28   : > { %p5520_p11 = por %p5519_p10, %p5518_p9 }
 0xb29   : > { %p5516_p8 = pneg %p5515_p7 }
 0xb2a   : > { %p5522_p13 = por %p5521_p12, %p5520_p11 }
 0xb2c   : > { %p5523_p0 = pnand %p5522_p13, %p5516_p8 }
 0xb2e   : > { %5526 = shalt.err (!%p5523_p0)
}
 0xb2f   : > { %5254 = dma.vmem_to_hbm [thread:$0]  (%p5685_p5), %s6810_s29, 128, %s6808_s26, %s4234_s30  }
 0xb30 PF: > { %s6878_s16 = sld [smem:[#allocation5_spill]]  ;;  %p5260_p1 = scmp.ge.s32.totalorder %s5561_s21, 2 }
 0xb32   : > { %p5257_p2 = pnand %p5260_p1, %p5689_p6 }
 0xb36   : > { %s4259_s20 = sand.u32 1, %s6878_s16  }
 0xb37   : > { %s4260_s24 = scalar_lea.sflag [#allocation3], %s4259_s20 }
 0xb38   : > { %5544 = dma.done.wait (!%p5257_p2), %s4260_s24, 128  }
 0xb39   : > { %5546 = vsyncadd (!%p5257_p2), %s4260_s24, 4294967168  ;;  %s6880_s21 = sld [smem:[#allocation7_spill]]  ;;  %s6881_s23 = sld [smem:[#allocation6_spill]] }
 0xb3a   : > { %s6882_s20 = sld [smem:[#allocation8_spill]]  ;;  %s6883_s18 = smov %s5553_s19 }
 0xb3f   : > { %p25_p3 = scmp.ge.s32.totalorder %s6880_s21, 4   ;;  %s6884_s19 = smov %s6881_s23 }
 0xb41   :  { %27 = sbr.rel (!%p25_p3) target bundleno = 3 (0x3), region = 127 }
 0xb48   :  { %4265 = vsyncpa [#allocation3], 1 }
 0xb49   :  { %4267 = vsyncpa [#allocation3 + $0x1], 1 }

</bundles_post_ra>
